<compile_context>
chip_gen: v7x
topology: tpu7x:2x2x1
jax: 0.10.0
libtpu: 0.0.40
codegen_flags: <defaults>
</compile_context>

<pallas_src>
import jax
import jax.numpy as jnp
from jax.experimental import pallas as pl
from jax.experimental.pallas import tpu as pltpu

_EPS2 = 1e-24  # (F.normalize eps = 1e-12) squared


# --------------------------------------------------------------------------- #
# Kernel
# --------------------------------------------------------------------------- #
def _vlad_encoder_kernel(x_ref, w1_ref, b1_ref, wa_ref, ba_ref,
                         cent_ref, w2_ref, b2_ref, out_ref):
    TB, N, D_in = x_ref.shape
    H = w1_ref.shape[1]
    K = cent_ref.shape[0]
    D_out = out_ref.shape[-1]

    # ---- fc1 + ReLU --------------------------------------------------------
    # Leading-dim merge (TB, N) -> TB*N is layout-free when N % 8 == 0.
    # fc1 / assignment are the small matmuls; keep them f32 so the softmax
    # logits (and hence the soft assignment) stay accurate.
    x = x_ref[...].astype(jnp.float32).reshape(TB * N, D_in)
    h = jnp.dot(x, w1_ref[...].astype(jnp.float32),
                preferred_element_type=jnp.float32) + b1_ref[...].astype(jnp.float32)
    h = jnp.maximum(h, 0.0)                                           # [TB*N, H]

    # ---- NetVLAD input normalization: per-descriptor L2 over channels ------
    xn = h * jax.lax.rsqrt(jnp.maximum(
        jnp.sum(h * h, axis=-1, keepdims=True), _EPS2))               # [TB*N, H]

    # ---- soft assignment: 1x1 conv == channel matmul + softmax over K ------
    logits = jnp.dot(xn, wa_ref[...].astype(jnp.float32),
                     preferred_element_type=jnp.float32) + ba_ref[...].astype(jnp.float32)
    logits = logits - jnp.max(logits, axis=-1, keepdims=True)
    e = jnp.exp(logits)
    # approx reciprocal -> EUP slot, effectively free next to the matmuls
    assign = e * pl.reciprocal(jnp.sum(e, axis=-1, keepdims=True), approx=True)

    a3 = assign.reshape(TB, N, K)     # leading-dim split: free (N % 8 == 0)
    x3 = xn.reshape(TB, N, H)

    # ---- VLAD aggregation: ONE batched MXU contraction over frames ---------
    # agg[b,k,h] = sum_n a[b,n,k] * x[b,n,h]; bf16 operands, f32 accumulate.
    agg = jnp.einsum("bnk,bnh->bkh",
                     a3.astype(jnp.bfloat16), x3.astype(jnp.bfloat16),
                     preferred_element_type=jnp.float32)              # [TB,K,H]
    s = jnp.sum(a3, axis=1)[:, :, None]                               # [TB,K,1] (f32)
    vlad = agg - s * cent_ref[...].astype(jnp.float32)[None]          # [TB,K,H]

    # ---- intra-normalization (per cluster, over H) --------------------------
    ss = jnp.sum(vlad * vlad, axis=-1, keepdims=True)                 # [TB,K,1]
    inv = jax.lax.rsqrt(jnp.maximum(ss, _EPS2))
    vlad = vlad * inv
    # sum-of-squares of the intra-normalized flattened VLAD, without
    # re-multiplying / re-reducing the normalized [TB,K,H] tensor.
    ss_tot = jnp.sum(ss * (inv * inv), axis=1)                        # [TB,1]

    # ---- fc2 over the flattened (K*H) axis: ONE MXU matmul ------------------
    vlad2 = vlad.reshape(TB, K * H).astype(jnp.bfloat16)              # [TB, K*H]
    w2 = w2_ref[...].reshape(K * H, D_out)       # layout-friendly when H%8==0
    acc = jnp.dot(vlad2, w2, preferred_element_type=jnp.float32)      # [TB, D_out]

    # Global L2 norm of the flattened VLAD commutes with the linear fc2:
    #   relu(fc2(g * vlad_flat)) = relu(g * (vlad_flat @ W2) + b2),  g per-row.
    g = jax.lax.rsqrt(jnp.maximum(ss_tot, _EPS2))                     # [TB,1]
    out = jnp.maximum(acc * g + b2_ref[...].astype(jnp.float32), 0.0)
    out_ref[...] = out.astype(out_ref.dtype)


# --------------------------------------------------------------------------- #
# Wrapper helpers
# --------------------------------------------------------------------------- #
def _buffered_supported():
    """True if this JAX exposes per-BlockSpec pipeline_mode / pl.Buffered."""
    if not hasattr(pl, "Buffered"):
        return False
    try:
        pl.BlockSpec((8, 128), lambda i: (0, 0), pipeline_mode=pl.Buffered(1))
        return True
    except TypeError:
        return False


def _resident_spec(shape, buffered_ok):
    """BlockSpec for a grid-invariant (weight) operand: single-buffered."""
    index_map = lambda i: (0,) * len(shape)
    if buffered_ok:
        return pl.BlockSpec(shape, index_map, pipeline_mode=pl.Buffered(1))
    return pl.BlockSpec(shape, index_map)


def _vmem_limit_bytes():
    """Generation-aware scoped-VMEM budget (half of physical, capped 64 MiB)."""
    try:
        phys = int(pltpu.get_tpu_info().vmem_capacity_bytes)
    except Exception:
        phys = 64 * 1024 * 1024            # conservative (v7x per-TC) fallback
    return int(min(phys // 2, 64 * 1024 * 1024))


def _pick_tb(B, N, D_in, H, K, D_out, weight_bytes, vmem_limit, in_itemsize=4):
    """Batch-tile size from a weight-aware VMEM budget."""
    headroom = 2 * 1024 * 1024
    budget = max(vmem_limit - weight_bytes - headroom, 1 * 1024 * 1024)
    # Per-batch-row VMEM: double-buffered input/output tiles + f32 intermediates.
    per_row = (2 * N * D_in * in_itemsize          # pipelined input tile (x2 bufs)
               + 2 * D_out * 4                     # pipelined output tile (x2 bufs)
               + 4 * (2 * N * H                    # h, xn
                      + 3 * N * K                  # logits, e, assign
                      + 3 * K * H                  # agg, vlad, bf16 staging
                      + 4 * D_out + 2 * K))        # acc, out, s, ss
    tb = max(1, budget // max(per_row, 1))
    tb = min(tb, B)
    # Guarantee >= 2 grid steps when possible: v7x megacore sharding across the
    # two TensorCores + DMA/compute overlap on every generation.
    if tb >= B and B > 8:
        tb = pl.cdiv(B, 2)
    if tb < B:
        # Output tile is (tb, D_out): keep tb sublane-aligned, clamped to B.
        tb = min(B, max(8, (tb // 8) * 8))
    return int(tb)


# --------------------------------------------------------------------------- #
# Public forward
# --------------------------------------------------------------------------- #
def vlad_encoder_forward(input_data, params, *, tb=None):
    """Fused vlad_encoder.forward.  input_data: [B, N, D_in] (f32 or bf16)."""
    B, N, D_in = input_data.shape
    H = params["w1"].shape[1]
    K = params["centroids"].shape[0]
    D_out = params["b2"].shape[-1]

    # fc2 weight: k-major reshape (matches torch vlad.view(B, -1) flatten) and
    # bf16 storage -> half the HBM DMA bytes and half the VMEM residency.
    w2 = params["w2"].reshape(K, H, D_out).astype(jnp.bfloat16)

    buffered_ok = _buffered_supported()
    buf = 1 if buffered_ok else 2
    weight_bytes = buf * (params["w1"].size * 4 + params["b1"].size * 4
                          + params["w_assign"].size * 4 + params["b_assign"].size * 4
                          + params["centroids"].size * 4
                          + w2.size * 2 + params["b2"].size * 4)

    vmem_limit = _vmem_limit_bytes()
    if tb is None:
        tb = _pick_tb(B, N, D_in, H, K, D_out, weight_bytes, vmem_limit,
                      in_itemsize=input_data.dtype.itemsize)
    grid = (pl.cdiv(B, tb),)

    in_specs = [
        pl.BlockSpec((tb, N, D_in), lambda i: (i, 0, 0)),     # input tile (pipelined)
        _resident_spec((D_in, H), buffered_ok),               # fc1 weight
        _resident_spec((1, H), buffered_ok),                  # fc1 bias
        _resident_spec((H, K), buffered_ok),                  # assignment weight
        _resident_spec((1, K), buffered_ok),                  # assignment bias
        _resident_spec((K, H), buffered_ok),                  # centroids
        _resident_spec((K, H, D_out), buffered_ok),           # fc2 weight (bf16, k-major)
        _resident_spec((1, D_out), buffered_ok),              # fc2 bias
    ]
    out_specs = pl.BlockSpec((tb, D_out), lambda i: (i, 0))

    return pl.pallas_call(
        _vlad_encoder_kernel,
        grid=grid,
        in_specs=in_specs,
        out_specs=out_specs,
        out_shape=jax.ShapeDtypeStruct((B, D_out), jnp.float32),
        compiler_params=pltpu.CompilerParams(
            dimension_semantics=("parallel",),   # shard batch tiles over v7x's two TCs
            vmem_limit_bytes=vmem_limit,
        ),
    )(input_data, params["w1"], params["b1"], params["w_assign"],
      params["b_assign"], params["centroids"], w2, params["b2"])


# --------------------------------------------------------------------------- #
# Params / reference / demo
# --------------------------------------------------------------------------- #
def init_params(key, d_in, hidden, centre_num, d_out, alpha=1.0):
    """Matches vlad_encoder.__init__ / NetVLAD._init_params."""
    k1, k2, k3, k4, k5 = jax.random.split(key, 5)
    centroids = jax.random.uniform(k2, (centre_num, hidden), jnp.float32)    # torch.rand
    w_assign = (2.0 * alpha * centroids).T                                   # [H, K]
    b_assign = (-alpha * jnp.linalg.norm(centroids, axis=1))[None, :]        # [1, K]
    lim1 = 1.0 / float(jnp.sqrt(d_in))
    lim2 = 1.0 / float(jnp.sqrt(centre_num * hidden))
    return {
        "w1": jax.random.uniform(k1, (d_in, hidden), jnp.float32, -lim1, lim1),
        "b1": jax.random.uniform(k4, (1, hidden), jnp.float32, -lim1, lim1),
        "w_assign": w_assign,
        "b_assign": b_assign,
        "centroids": centroids,
        "w2": jax.random.uniform(k3, (centre_num * hidden, d_out), jnp.float32, -lim2, lim2),
        "b2": jax.random.uniform(k5, (1, d_out), jnp.float32, -lim2, lim2),
    }


def _reference(x, params):
    """Pure-JAX f32 reference of the same forward pass."""
    B = x.shape[0]
    K, H = params["centroids"].shape
    h = jnp.maximum(jnp.einsum("bnd,dh->bnh", x, params["w1"]) + params["b1"], 0.0)
    xn = h / jnp.maximum(jnp.linalg.norm(h, axis=-1, keepdims=True), 1e-12)
    logits = jnp.einsum("bnh,hk->bnk", xn, params["w_assign"]) + params["b_assign"]
    a = jax.nn.softmax(logits, axis=-1)
    agg = jnp.einsum("bnk,bnh->bkh", a, xn)
    s = jnp.sum(a, axis=1)
    vlad = agg - s[:, :, None] * params["centroids"][None]
    vlad = vlad / jnp.maximum(jnp.linalg.norm(vlad, axis=-1, keepdims=True), 1e-12)
    vflat = vlad.reshape(B, K * H)
    vflat = vflat / jnp.maximum(jnp.linalg.norm(vflat, axis=-1, keepdims=True), 1e-12)
    return jnp.maximum(vflat @ params["w2"] + params["b2"], 0.0)


if __name__ == "__main__":
    key = jax.random.PRNGKey(0)
    k_x, k_p = jax.random.split(key)

    # Small but lane/sublane-friendly sizes: hidden/out dims multiples of 128
    # (lane-dense stores), N multiple of 8 (free reshapes), B=16 so the batch
    # tiler produces a 2-step grid (megacore sharding exercised).
    B, N = 16, 16
    D_IN, HIDDEN, CENTRES, D_OUT = 32, 128, 8, 128

    x = jax.random.normal(k_x, (B, N, D_IN), jnp.float32)
    params = init_params(k_p, D_IN, HIDDEN, CENTRES, D_OUT, alpha=1.0)

    out = vlad_encoder_forward(x, params)
    jax.block_until_ready(out)

    ref = _reference(x, params)
    assert out.shape == (B, D_OUT)
    scale = float(jnp.max(jnp.abs(ref))) + 1e-6
    err = float(jnp.max(jnp.abs(out - ref)))
    # bf16 MXU operands + approx reciprocal -> compare with a relative tolerance.
    assert err / scale < 3e-2, f"rel err {err / scale} (abs {err}, scale {scale})"

    print("KERNEL_OK")
</pallas_src>

<mosaic_0001>
module attributes {stable_mosaic.version = 11 : i64} {
  func.func @_vlad_encoder_kernel(%arg0: i32, %arg1: memref<8x16x32xf32, #tpu.memory_space<vmem>>, %arg2: memref<32x128xf32, #tpu.memory_space<vmem>>, %arg3: memref<1x128xf32, #tpu.memory_space<vmem>>, %arg4: memref<128x8xf32, #tpu.memory_space<vmem>>, %arg5: memref<1x8xf32, #tpu.memory_space<vmem>>, %arg6: memref<8x128xf32, #tpu.memory_space<vmem>>, %arg7: memref<8x128x128xbf16, #tpu.memory_space<vmem>>, %arg8: memref<1x128xf32, #tpu.memory_space<vmem>>, %arg9: memref<8x128xf32, #tpu.memory_space<vmem>>) attributes {dimension_semantics = [#tpu.dimension_semantics<parallel>], iteration_bounds = array<i64: 2>, scalar_prefetch = 0 : i64, scratch_operands = 0 : i64, tpu.core_type = #tpu.core_type<tc>, window_params = [{transform_indices = @transform_0, window_bounds = array<i64: 8, 16, 32>}, {pipeline_mode = #tpu.pipeline_mode<synchronous>, transform_indices = @transform_1, window_bounds = array<i64: 32, 128>}, {pipeline_mode = #tpu.pipeline_mode<synchronous>, transform_indices = @transform_2, window_bounds = array<i64: 1, 128>}, {pipeline_mode = #tpu.pipeline_mode<synchronous>, transform_indices = @transform_3, window_bounds = array<i64: 128, 8>}, {pipeline_mode = #tpu.pipeline_mode<synchronous>, transform_indices = @transform_4, window_bounds = array<i64: 1, 8>}, {pipeline_mode = #tpu.pipeline_mode<synchronous>, transform_indices = @transform_5, window_bounds = array<i64: 8, 128>}, {pipeline_mode = #tpu.pipeline_mode<synchronous>, transform_indices = @transform_6, window_bounds = array<i64: 8, 128, 128>}, {pipeline_mode = #tpu.pipeline_mode<synchronous>, transform_indices = @transform_7, window_bounds = array<i64: 1, 128>}, {transform_indices = @transform_8, window_bounds = array<i64: 8, 128>}]} {
    %c0 = arith.constant 0 : index
    %c0_0 = arith.constant 0 : index
    %c0_1 = arith.constant 0 : index
    %0 = vector.load %arg1[%c0, %c0_0, %c0_1] : memref<8x16x32xf32, #tpu.memory_space<vmem>>, vector<8x16x32xf32>
    %1 = vector.shape_cast %0 : vector<8x16x32xf32> to vector<128x32xf32>
    %c0_2 = arith.constant 0 : index
    %c0_3 = arith.constant 0 : index
    %2 = vector.load %arg2[%c0_2, %c0_3] : memref<32x128xf32, #tpu.memory_space<vmem>>, vector<32x128xf32>
    %cst = arith.constant dense<0.000000e+00> : vector<128x128xf32>
    %3 = tpu.matmul %1, %2, %cst {dimension_numbers = #tpu.dot_dimension_numbers<[1], [0], [0], [1], [0, 0, 1, 1], [], []>} : vector<128x32xf32>, vector<32x128xf32>, vector<128x128xf32> -> vector<128x128xf32>
    %c0_4 = arith.constant 0 : index
    %c0_5 = arith.constant 0 : index
    %4 = vector.load %arg3[%c0_4, %c0_5] : memref<1x128xf32, #tpu.memory_space<vmem>>, vector<1x128xf32>
    %5 = vector.broadcast %4 : vector<1x128xf32> to vector<128x128xf32>
    %6 = arith.addf %3, %5 : vector<128x128xf32>
    %cst_6 = arith.constant 0.000000e+00 : f32
    %7 = vector.broadcast %cst_6 : f32 to vector<128x128xf32>
    %8 = arith.maximumf %6, %7 : vector<128x128xf32>
    %9 = arith.mulf %8, %8 : vector<128x128xf32>
    %cst_7 = arith.constant dense<0.000000e+00> : vector<128xf32>
    %10 = vector.multi_reduction <add>, %9, %cst_7 [1] : vector<128x128xf32> to vector<128xf32>
    %11 = vector.shape_cast %10 : vector<128xf32> to vector<128x1xf32>
    %cst_8 = arith.constant 1.000000e-24 : f32
    %12 = vector.broadcast %cst_8 : f32 to vector<128x1xf32>
    %13 = arith.maximumf %11, %12 : vector<128x1xf32>
    %14 = math.rsqrt %13 : vector<128x1xf32>
    %15 = vector.broadcast %14 : vector<128x1xf32> to vector<128x128xf32>
    %16 = arith.mulf %8, %15 : vector<128x128xf32>
    %c0_9 = arith.constant 0 : index
    %c0_10 = arith.constant 0 : index
    %17 = vector.load %arg4[%c0_9, %c0_10] : memref<128x8xf32, #tpu.memory_space<vmem>>, vector<128x8xf32>
    %cst_11 = arith.constant dense<0.000000e+00> : vector<128x8xf32>
    %18 = tpu.matmul %16, %17, %cst_11 {dimension_numbers = #tpu.dot_dimension_numbers<[1], [0], [0], [1], [0, 0, 1, 1], [], []>} : vector<128x128xf32>, vector<128x8xf32>, vector<128x8xf32> -> vector<128x8xf32>
    %c0_12 = arith.constant 0 : index
    %c0_13 = arith.constant 0 : index
    %19 = vector.load %arg5[%c0_12, %c0_13] : memref<1x8xf32, #tpu.memory_space<vmem>>, vector<1x8xf32>
    %20 = vector.broadcast %19 : vector<1x8xf32> to vector<128x8xf32>
    %21 = arith.addf %18, %20 : vector<128x8xf32>
    %cst_14 = arith.constant dense<0xFF800000> : vector<128xf32>
    %22 = vector.multi_reduction <maximumf>, %21, %cst_14 [1] : vector<128x8xf32> to vector<128xf32>
    %23 = vector.shape_cast %22 : vector<128xf32> to vector<128x1xf32>
    %24 = vector.broadcast %23 : vector<128x1xf32> to vector<128x8xf32>
    %25 = arith.subf %21, %24 : vector<128x8xf32>
    %26 = math.exp %25 : vector<128x8xf32>
    %cst_15 = arith.constant dense<0.000000e+00> : vector<128xf32>
    %27 = vector.multi_reduction <add>, %26, %cst_15 [1] : vector<128x8xf32> to vector<128xf32>
    %28 = vector.shape_cast %27 : vector<128xf32> to vector<128x1xf32>
    %29 = tpu.reciprocal %28 {approx = true} : vector<128x1xf32> -> vector<128x1xf32>
    %30 = vector.broadcast %29 : vector<128x1xf32> to vector<128x8xf32>
    %31 = arith.mulf %26, %30 : vector<128x8xf32>
    %32 = vector.shape_cast %31 : vector<128x8xf32> to vector<8x16x8xf32>
    %33 = vector.shape_cast %16 : vector<128x128xf32> to vector<8x16x128xf32>
    %34 = arith.truncf %32 : vector<8x16x8xf32> to vector<8x16x8xbf16>
    %35 = arith.truncf %33 : vector<8x16x128xf32> to vector<8x16x128xbf16>
    "tpu.trace_start"() <{level = 10 : i32, message = "bnk,bnh->bkh"}> : () -> ()
    %cst_16 = arith.constant dense<0.000000e+00> : vector<8x8x128xf32>
    %36 = tpu.matmul %34, %35, %cst_16 {dimension_numbers = #tpu.dot_dimension_numbers<[1], [1], [2], [2], [0, 0, 0, 2, 1, 2], [0], [0]>} : vector<8x16x8xbf16>, vector<8x16x128xbf16>, vector<8x8x128xf32> -> vector<8x8x128xf32>
    "tpu.trace_stop"() : () -> ()
    %cst_17 = arith.constant dense<0.000000e+00> : vector<8x8xf32>
    %37 = vector.multi_reduction <add>, %32, %cst_17 [1] : vector<8x16x8xf32> to vector<8x8xf32>
    %38 = vector.shape_cast %37 : vector<8x8xf32> to vector<8x8x1xf32>
    %c0_18 = arith.constant 0 : index
    %c0_19 = arith.constant 0 : index
    %39 = vector.load %arg6[%c0_18, %c0_19] : memref<8x128xf32, #tpu.memory_space<vmem>>, vector<8x128xf32>
    %40 = vector.shape_cast %39 : vector<8x128xf32> to vector<1x8x128xf32>
    %41 = vector.broadcast %38 : vector<8x8x1xf32> to vector<8x8x128xf32>
    %42 = vector.broadcast %40 : vector<1x8x128xf32> to vector<8x8x128xf32>
    %43 = arith.mulf %41, %42 : vector<8x8x128xf32>
    %44 = arith.subf %36, %43 : vector<8x8x128xf32>
    %45 = arith.mulf %44, %44 : vector<8x8x128xf32>
    %cst_20 = arith.constant dense<0.000000e+00> : vector<8x8xf32>
    %46 = vector.multi_reduction <add>, %45, %cst_20 [2] : vector<8x8x128xf32> to vector<8x8xf32>
    %47 = vector.shape_cast %46 : vector<8x8xf32> to vector<8x8x1xf32>
    %cst_21 = arith.constant 1.000000e-24 : f32
    %48 = vector.broadcast %cst_21 : f32 to vector<8x8x1xf32>
    %49 = arith.maximumf %47, %48 : vector<8x8x1xf32>
    %50 = math.rsqrt %49 : vector<8x8x1xf32>
    %51 = vector.broadcast %50 : vector<8x8x1xf32> to vector<8x8x128xf32>
    %52 = arith.mulf %44, %51 : vector<8x8x128xf32>
    %53 = arith.mulf %50, %50 : vector<8x8x1xf32>
    %54 = arith.mulf %47, %53 : vector<8x8x1xf32>
    %cst_22 = arith.constant dense<0.000000e+00> : vector<8x1xf32>
    %55 = vector.multi_reduction <add>, %54, %cst_22 [1] : vector<8x8x1xf32> to vector<8x1xf32>
    %56 = vector.shape_cast %52 : vector<8x8x128xf32> to vector<8x1024xf32>
    %57 = arith.truncf %56 : vector<8x1024xf32> to vector<8x1024xbf16>
    %c0_23 = arith.constant 0 : index
    %c0_24 = arith.constant 0 : index
    %c0_25 = arith.constant 0 : index
    %58 = vector.load %arg7[%c0_23, %c0_24, %c0_25] : memref<8x128x128xbf16, #tpu.memory_space<vmem>>, vector<8x128x128xbf16>
    %59 = vector.shape_cast %58 : vector<8x128x128xbf16> to vector<1024x128xbf16>
    %cst_26 = arith.constant dense<0.000000e+00> : vector<8x128xf32>
    %60 = tpu.matmul %57, %59, %cst_26 {dimension_numbers = #tpu.dot_dimension_numbers<[1], [0], [0], [1], [0, 0, 1, 1], [], []>} : vector<8x1024xbf16>, vector<1024x128xbf16>, vector<8x128xf32> -> vector<8x128xf32>
    %cst_27 = arith.constant 1.000000e-24 : f32
    %61 = vector.broadcast %cst_27 : f32 to vector<8x1xf32>
    %62 = arith.maximumf %55, %61 : vector<8x1xf32>
    %63 = math.rsqrt %62 : vector<8x1xf32>
    %64 = vector.broadcast %63 : vector<8x1xf32> to vector<8x128xf32>
    %65 = arith.mulf %60, %64 : vector<8x128xf32>
    %c0_28 = arith.constant 0 : index
    %c0_29 = arith.constant 0 : index
    %66 = vector.load %arg8[%c0_28, %c0_29] : memref<1x128xf32, #tpu.memory_space<vmem>>, vector<1x128xf32>
    %67 = vector.broadcast %66 : vector<1x128xf32> to vector<8x128xf32>
    %68 = arith.addf %65, %67 : vector<8x128xf32>
    %cst_30 = arith.constant 0.000000e+00 : f32
    %69 = vector.broadcast %cst_30 : f32 to vector<8x128xf32>
    %70 = arith.maximumf %68, %69 : vector<8x128xf32>
    %c0_31 = arith.constant 0 : index
    %c0_32 = arith.constant 0 : index
    %71 = vector.load %arg9[%c0_31, %c0_32] : memref<8x128xf32, #tpu.memory_space<vmem>>, vector<8x128xf32>
    tpu.vector_store %arg9[%c0_31, %c0_32], %70 {strides = array<i32>} : memref<8x128xf32, #tpu.memory_space<vmem>>, vector<8x128xf32>,
    return
  }
  func.func @transform_0(%arg0: i32) -> (i32, i32, i32) {
    %c0_i32 = arith.constant 0 : i32
    %c0_i32_0 = arith.constant 0 : i32
    %c0_i32_1 = arith.constant 0 : i32
    return %arg0, %c0_i32, %c0_i32_0 : i32, i32, i32
  }
  func.func @transform_1(%arg0: i32) -> (i32, i32) {
    %c0_i32 = arith.constant 0 : i32
    %c0_i32_0 = arith.constant 0 : i32
    %c0_i32_1 = arith.constant 0 : i32
    return %c0_i32, %c0_i32_0 : i32, i32
  }
  func.func @transform_2(%arg0: i32) -> (i32, i32) {
    %c0_i32 = arith.constant 0 : i32
    %c0_i32_0 = arith.constant 0 : i32
    %c0_i32_1 = arith.constant 0 : i32
    return %c0_i32, %c0_i32_0 : i32, i32
  }
  func.func @transform_3(%arg0: i32) -> (i32, i32) {
    %c0_i32 = arith.constant 0 : i32
    %c0_i32_0 = arith.constant 0 : i32
    %c0_i32_1 = arith.constant 0 : i32
    return %c0_i32, %c0_i32_0 : i32, i32
  }
  func.func @transform_4(%arg0: i32) -> (i32, i32) {
    %c0_i32 = arith.constant 0 : i32
    %c0_i32_0 = arith.constant 0 : i32
    %c0_i32_1 = arith.constant 0 : i32
    return %c0_i32, %c0_i32_0 : i32, i32
  }
  func.func @transform_5(%arg0: i32) -> (i32, i32) {
    %c0_i32 = arith.constant 0 : i32
    %c0_i32_0 = arith.constant 0 : i32
    %c0_i32_1 = arith.constant 0 : i32
    return %c0_i32, %c0_i32_0 : i32, i32
  }
  func.func @transform_6(%arg0: i32) -> (i32, i32, i32) {
    %c0_i32 = arith.constant 0 : i32
    %c0_i32_0 = arith.constant 0 : i32
    %c0_i32_1 = arith.constant 0 : i32
    %c0_i32_2 = arith.constant 0 : i32
    return %c0_i32, %c0_i32_0, %c0_i32_1 : i32, i32, i32
  }
  func.func @transform_7(%arg0: i32) -> (i32, i32) {
    %c0_i32 = arith.constant 0 : i32
    %c0_i32_0 = arith.constant 0 : i32
    %c0_i32_1 = arith.constant 0 : i32
    return %c0_i32, %c0_i32_0 : i32, i32
  }
  func.func @transform_8(%arg0: i32) -> (i32, i32) {
    %c0_i32 = arith.constant 0 : i32
    %c0_i32_0 = arith.constant 0 : i32
    return %arg0, %c0_i32 : i32, i32
  }
}

</mosaic_0001>

<bundles_post_ra>
// kernel: tpu_custom_call.1
= control target key start
LH: loop header
LB: loop body
LE: loop exit
PB: predicated region body
PF: predicated region fallthrough
CT: control target
= control target key end

     0   :  { %13 = vsyncpa [#allocation3], 0  ;;  %s4350_s0 = inlined_call_operand.hbm [shape: f32[16,16,32], index: 0, kind: input, shape index: {}]   ;;  %s4351_s1 = inlined_call_operand.vmem [shape: f32[32,128], index: 1, kind: input, shape index: {}]   ;;  %s4352_s2 = inlined_call_operand.vmem [shape: f32[1,128], index: 2, kind: input, shape index: {}]   ;;  %s4353_s3 = inlined_call_operand.vmem [shape: f32[128,8], index: 3, kind: input, shape index: {}]   ;;  %s4354_s4 = inlined_call_operand.vmem [shape: f32[1,8], index: 4, kind: input, shape index: {}]   ;;  %s4355_s5 = inlined_call_operand.vmem [shape: f32[8,128], index: 5, kind: input, shape index: {}]   ;;  %s4356_s6 = inlined_call_operand.hbm [shape: bf16[8,128,128], index: 6, kind: input, shape index: {}]   ;;  %s4357_s7 = inlined_call_operand.vmem [shape: f32[1,128], index: 7, kind: input, shape index: {}]   ;;  %s4358_s8 = inlined_call_operand.hbm [shape: f32[16,128], index: 8, kind: output, shape index: {}]  }
   0x1   :  { %15 = vsyncpa [#allocation3 + $0x1], 0 }
   0x2   :  { %16 = vsyncpa [#allocation6], 0 }
   0x3   :  { %17 = vsyncpa [#allocation4], 0 }
   0x4   :  { %19 = vsyncpa [#allocation4 + $0x1], 0  ;;  %s3579_s27 = smov 0   ;;  %s3581_s28 = smov 0  }
   0x5   :  { %s3583_s29 = smov 0   ;;  %s3585_s30 = smov 0  }
   0x6 LB: > { %s3600_s9 = sadd.s32 4294967295, %s3521_s30   ;;  %s2694_s10 = sadd.s32 4294967294, %s3521_s30   ;;  %s3521_s30 = sphi %s3585_s30, %s4378_s30   ;;  %s3517_s29 = sphi %s3583_s29, %s4381_s29   ;;  %s3513_s28 = sphi %s3581_s28, %s4380_s28   ;;  %s3509_s27 = sphi %s3579_s27, %s4379_s27  }
   0x7   : > { %p45_p0 = scmp.ne.s32.totalorder %s3513_s28, %s3509_s27  ;;  %p4359_p1 = scmp.eq.s32.totalorder %s3600_s9, 0 }
   0x8   : > { %p222_p3 = scmp.eq.s32.totalorder %s2694_s10, 1  ;;  %p2695_p5 = scmp.ge.s32.totalorder %s3521_s30, 1 }
   0x9   : > { %p3609_p4 = por %p4359_p1, %p45_p0  ;;  %p229_p7 = scmp.lt.s32.totalorder %s3521_s30, 3 }
   0xa   : > { %p3614_p6 = por %p222_p3, %p45_p0  ;;  %s3523_s14 = smov [#allocation5]  }
   0xb   : > { %s4364_s11 = scalar_select %p3609_p4, 1, 0 }
   0xc   : > { %s4365_s12 = scalar_select %p3614_p6, 1, 0 }
   0xd   : > { %p3619_p8 = pnand %p2695_p5, %p229_p7  ;;  %s256_s15 = sshll.u32 %s3523_s14, 4  ;;  %s3623_s15 = int_to_ptr.vmem [resolvable:$true] %s256_s15 }
   0xe   : > { %s3635_s17 = sadd.s32 1, %s3521_s30   ;;  %s32_s18 = sadd.s32 1, %s3517_s29 }
   0xf   : > { %s4366_s13 = scalar_select %p3619_p8, 1, 0 }
  0x10   : > { %p3143_p9 = pneg %p3619_p8  ;;  %4368 = sst [smem:[#allocation11_spill]] %s3635_s17 }
  0x11   : > { %s29_s19 = ssub.s32 %s3521_s30, %s3635_s17  ;;  %s3393_s22 = scalar_lea.hbm %s4356_s6, 8192 }
  0x12   : > { %p3630_p11 = pnand %p3143_p9, %p4359_p1  ;;  %p3394_p12 = scmp.ne.s32.totalorder %s4356_s6, %s3393_s22 }
  0x13   : > { %p3400_p5 = scmp.lt.u32.totalorder %s3393_s22, %s4356_s6 }
  0x14   : > { %p3395_p13 = pneg %p3630_p11 }
  0x16   : > { %p3396_p0 = pnand %p3395_p13, %p3394_p12 }
  0x18   : > { %p3397_p3 = pneg %p3396_p0 }
  0x1a   : > { %p3402_p7 = pnand %p3400_p5, %p3397_p3 }
  0x1c   : > { %3405 = shalt.err (!%p3402_p7)
}
  0x1d   : > { %s3406_s10 = scalar_lea.vmem %s3623_s15, 8192  ;;  %p3414_p2 = scmp.lt.s32.totalorder %s3623_s15, %s3623_s15 }
  0x1e   : > { %p3407_p9 = scmp.ne.s32.totalorder %s3623_s15, %s3406_s10  ;;  %p3415_p6 = scmp.lt.s32.totalorder %s3406_s10, %s3406_s10 }
  0x20   : > { %p3409_p10 = pnand %p3407_p9, %p3395_p13  ;;  %p3416_p4 = por %p3415_p6, %p3414_p2 }
  0x22   : > { %p3410_p1 = pneg %p3409_p10 }
  0x24   : > { %p3417_p8 = pnand %p3416_p4, %p3410_p1 }
  0x26   : > { %3420 = shalt.err (!%p3417_p8)
}
  0x27   : > { %s3524_s14 = smov 64   ;;  %s3525_s20 = smov 4  }
  0x28   : > { %3146 = dma.hbm_to_vmem [thread:$0]  (!%p3630_p11), %s4356_s6, 8192, %s3623_s15, [#allocation6], %s3524_s14, %s3524_s14, %s3525_s20  }
  0x29   : > { %p30_p2 = scmp.eq.s32.totalorder %s29_s19, 0  ;;  %p39_p1 = scmp.ne.s32.totalorder %s3517_s29, %s3513_s28 }
  0x2a   : > { %p40_p4 = scmp.eq.s32.totalorder %s3521_s30, 0  ;;  %p3156_p6 = scmp.lt.s32.totalorder %s3521_s30, 2 }
  0x2b   : > { %s3666_s23 = scalar_select %p30_p2, %s3517_s29, %s32_s18  }
  0x2c   : > { %p41_p8 = por %p40_p4, %p39_p1  ;;  %p4369_p10 = scmp.eq.s32.totalorder %s3600_s9, 1 }
  0x2d   : > { %s273_s25 = sand.u32 1, %s3517_s29   ;;  %s2802_s26 = sshll.u32 %s3521_s30, 11 }
  0x2e   : > { %p3670_p12 = por %p4369_p10, %p39_p1  ;;  %s2698_s10 = sshll.u32 %s273_s25, 7 }
  0x2f   : > { %s3679_s21 = scalar_lea.hbm %s4350_s0, %s2802_s26  ;;  %s277_s15 = scalar_lea.vmem [#allocation2], %s2698_s10 }
  0x30   : > { %s285_s18 = sshll.u32 %s277_s15, 4  ;;  %p3681_p11 = pnand %p3156_p6, %p41_p8  ;;  %s3685_s18 = int_to_ptr.vmem [resolvable:$true] %s285_s18 }
  0x31   : > { %s3687_s14 = scalar_lea.sflag [#allocation3], %s273_s25  ;;  %s3421_s20 = scalar_lea.hbm %s3679_s21, 2048 }
  0x32   : > { %p3422_p13 = scmp.ne.s32.totalorder %s3679_s21, %s3421_s20  ;;  %p3423_p0 = pneg %p3681_p11 }
  0x33   : > { %s3426_s26 = scalar_lea.hbm %s4350_s0, 4096  ;;  %p3427_p7 = scmp.lt.u32.totalorder %s3679_s21, %s4350_s0 }
  0x34   : > { %p3424_p3 = pnand %p3423_p0, %p3422_p13  ;;  %p3428_p9 = scmp.lt.u32.totalorder %s3426_s26, %s3421_s20 }
  0x35   : > { %p3430_p1 = scmp.lt.u32.totalorder %s3421_s20, %s3679_s21 }
  0x36   : > { %p3425_p5 = pneg %p3424_p3  ;;  %p3429_p2 = por %p3428_p9, %p3427_p7 }
  0x38   : > { %p3431_p4 = por %p3430_p1, %p3429_p2 }
  0x3a   : > { %p3432_p6 = pnand %p3431_p4, %p3425_p5 }
  0x3c   : > { %3435 = shalt.err (!%p3432_p6)
}
  0x3d   : > { %s3436_s25 = scalar_lea.vmem %s3685_s18, 2048  ;;  %s3526_s15 = smov [#allocation2]  }
  0x3e   : > { %p3437_p8 = scmp.ne.s32.totalorder %s3685_s18, %s3436_s25  ;;  %s3441_s17 = sshll.u32 %s3526_s15, 4  ;;  %s3442_s17 = int_to_ptr.vmem [resolvable:$false] %s3441_s17 }
  0x3f   : > { %s3443_s22 = scalar_lea.vmem %s3442_s17, 4096  ;;  %p3444_p3 = scmp.lt.s32.totalorder %s3685_s18, %s3442_s17 }
  0x40   : > { %p3439_p10 = pnand %p3437_p8, %p3423_p0  ;;  %p3445_p7 = scmp.lt.s32.totalorder %s3443_s22, %s3436_s25 }
  0x42   : > { %p3440_p13 = pneg %p3439_p10  ;;  %p3446_p9 = por %p3445_p7, %p3444_p3 }
  0x44   : > { %p3447_p2 = pnand %p3446_p9, %p3440_p13 }
  0x46   : > { %3450 = shalt.err (!%p3447_p2)
}
  0x47   : > { %s3527_s20 = smov 128   ;;  %s3528_s26 = smov 8  }
  0x48   : > { %3150 = dma.hbm_to_vmem [thread:$0]  (!%p3681_p11), %s3679_s21, 2048, %s3685_s18, %s3687_s14, %s3527_s20, %s3527_s20, %s3528_s26  }
  0x49   : > { %p4372_p0 = scmp.ne.s32.totalorder %s4366_s13, 0 }
  0x4a   : > { %s3718_s10 = sand.u32 (!%p4372_p0), 1, %s3513_s28   ;;  %p4373_p5 = scmp.ne.s32.totalorder (!%p4372_p0), %s4364_s11, 0 }
  0x4b   : > { %297 = sbr.rel (%p4372_p0) target bundleno = 1809 (0x711), region = 52  ;;  %s2703_s16 = sshll.u32 (!%p4372_p0), %s3718_s10, 7 }
  0x4c   : > { %s300_s25 = scalar_lea.sflag (!%p4372_p0), [#allocation3], %s3718_s10  ;;  %s3722_s15 = scalar_lea.vmem (!%p4372_p0), [#allocation2], %s2703_s16 }
  0x52   : > { %3496 = dma.done.wait (%p4373_p5), %s300_s25, 2048  }
  0x53   : > { %3498 = vsyncadd (%p4373_p5), %s300_s25, 4294965248  ;;  %p4374_p11 = scmp.eq.s32.totalorder %s3600_s9, 0 }
  0x55   : > { %3500 = dma.done.wait (%p4374_p11), [#allocation6], 8192   ;;  %p4375_p1 = pmov %p4374_p11 }
  0x56   : > { %vm369_vm0 = vcmask 261120   ;;  %v358_v0 = vld [vmem:[%s4351_s1] sm:$0xff]  ;;  %v359_v1 = vld [vmem:[%s4351_s1 + $0x8] sm:$0xff]  ;;  %v360_v2 = vld [vmem:[%s4351_s1 + $0x10] sm:$0xff]  ;;  %vm843_vm1 = vcmask 64512   ;;  %vm3530_vm2 = vmmov 0  }
  0x57   : > { %3502 = vsyncadd (%p4375_p1), [#allocation6], 4294959104  ;;  %v3095_v3 = vpack.c.bf16 %v359_v1, %v358_v0  ;;  %v361_v4 = vld [vmem:[%s4351_s1 + $0x18] sm:$0xff]  ;;  %v342_v5 = vld [vmem:[%s3722_s15] sm:$0xff]  ;;  %vm1052_vm3 = vcmask 130048   ;;  %vm2574_vm4 = vcmask 1041409  }
  0x58   : > { %v3099_v6 = vpack.c.bf16 %v361_v4, %v360_v2  ;;  %2967 = vmatprep.mubr.msk.f32.mxu0 %vm369_vm0, %v342_v5  ;;  %v343_v7 = vld [vmem:[%s3722_s15 + $0x8] sm:$0xff]  ;;  %v344_v8 = vld [vmem:[%s3722_s15 + $0x10] sm:$0xff]  ;;  %v345_v9 = vld [vmem:[%s3722_s15 + $0x18] sm:$0xff]  ;;  %vm2576_vm5 = vcmask 1042434   ;;  %vm2578_vm6 = vcmask 1043459   ;;  %vm2580_vm7 = vcmask 1044484  }
  0x59   : > { %3096 = vmatprep.subr.bf16.mxu0 %v3095_v3  ;;  %v346_v10 = vld [vmem:[%s3722_s15 + $0x20] sm:$0xff]  ;;  %v347_v11 = vld [vmem:[%s3722_s15 + $0x28] sm:$0xff]  ;;  %v348_v12 = vld [vmem:[%s3722_s15 + $0x30] sm:$0xff]  ;;  %vm2582_vm8 = vcmask 1045509   ;;  %vm2584_vm9 = vcmask 1046534   ;;  %vm2586_vm10 = vcmask 1047559  }
  0x5a   : > { %3098 = vmatpush3.bf16.msra.mxu0 %v3095_v3  ;;  %v349_v13 = vld [vmem:[%s3722_s15 + $0x38] sm:$0xff]  ;;  %v350_v14 = vld [vmem:[%s3722_s15 + $0x40] sm:$0xff]  ;;  %v351_v15 = vld [vmem:[%s3722_s15 + $0x48] sm:$0xff]  ;;  %s2705_s22 = sshll.u32 %s3718_s10, 3  ;;  %s2798_s16 = sshll.u32 %s3600_s9, 7 }
  0x5b   : > { %3100 = vmatprep.subr.bf16.mxu0 %v3099_v6  ;;  %v352_v16 = vld [vmem:[%s3722_s15 + $0x50] sm:$0xff]  ;;  %v353_v17 = vld [vmem:[%s3722_s15 + $0x58] sm:$0xff]  ;;  %v354_v18 = vld [vmem:[%s3722_s15 + $0x60] sm:$0xff]  ;;  %s339_s25 = scalar_lea.vmem [#allocation7], %s2705_s22  ;;  %s4306_s18 = scalar_lea.hbm %s4358_s8, %s2798_s16 }
  0x5c   : > { %v355_v19 = vld [vmem:[%s3722_s15 + $0x68] sm:$0xff]  ;;  %v356_v20 = vld [vmem:[%s3722_s15 + $0x70] sm:$0xff]  ;;  %v357_v21 = vld [vmem:[%s3722_s15 + $0x78] sm:$0xff]  ;;  %s2614_s13 = sshll.u32 %s339_s25, 4  ;;  %s2601_s19 = scalar_lea.sflag [#allocation4], %s3718_s10  ;;  %s4308_s13 = int_to_ptr.vmem [resolvable:$true] %s2614_s13 }
  0x5d   : > { %v675_v22 = vld [vmem:[%s4353_s3] sm:$0xff]  ;;  %v676_v23 = vld [vmem:[%s4353_s3 + $0x8] sm:$0xff]  ;;  %v677_v24 = vld [vmem:[%s4353_s3 + $0x10] sm:$0xff]  ;;  %s3451_s11 = scalar_lea.vmem %s4308_s13, 128  ;;  %s3533_s9 = smov [#allocation7]  }
  0x5e   : > { %3102 = vmatpush3.bf16.msra.mxu0 %v3099_v6  ;;  %v3103_v25 = vpack.c.bf16 %v676_v23, %v675_v22  ;;  %v678_v26 = vld [vmem:[%s4353_s3 + $0x18] sm:$0xff]  ;;  %v679_v28 = vld [vmem:[%s4353_s3 + $0x20] sm:$0xff]  ;;  %v680_v29 = vld [vmem:[%s4353_s3 + $0x28] sm:$0xff]  ;;  %p3452_p4 = scmp.ne.s32.totalorder %s4308_s13, %s3451_s11  ;;  %s3455_s14 = sshll.u32 %s3533_s9, 4  ;;  %s3456_s14 = int_to_ptr.vmem [resolvable:$false] %s3455_s14 }
  0x5f   : > { %v3107_v27 = vpack.c.bf16 %v678_v26, %v677_v24  ;;  %v3111_v30 = vpack.c.bf16 %v680_v29, %v679_v28  ;;  %v681_v31 = vld [vmem:[%s4353_s3 + $0x30] sm:$0xff]  ;;  %v682_v32 = vld [vmem:[%s4353_s3 + $0x38] sm:$0xff]  ;;  %v3803_v34 = vld [vmem:[%s4352_s2] ss:$0 sm:$0xff]  ;;  %s3457_s17 = scalar_lea.vmem %s3456_s14, 256  ;;  %p3458_p10 = scmp.lt.s32.totalorder %s4308_s13, %s3456_s14 }
  0x60   : > { %3104 = vmatprep.subr.bf16.mxu1 %v3103_v25  ;;  %v3115_v33 = vpack.c.bf16 %v682_v32, %v681_v31  ;;  %v686_v26 = vld [vmem:[%s4353_s3 + $0x58] sm:$0xff]  ;;  %p3453_p6 = pnand %p3452_p4, %p3670_p12  ;;  %p3459_p13 = scmp.lt.s32.totalorder %s3457_s17, %s3451_s11 }
  0x61   : > { %2968 = vmatmul.mubr.msk.f32.vlgmr.msra.gmra.mrb[0].mxu0 %vm369_vm0, %v343_v7  ;;  %3106 = vmatpush3.bf16.msra.mxu1 %v3103_v25  ;;  %v685_v25 = vld [vmem:[%s4353_s3 + $0x50] sm:$0xff] }
  0x62   : > { %2970 = vmatprep.mubr.msk.f32.mxu0 %vm369_vm0, %v344_v8  ;;  %3108 = vmatprep.subr.bf16.mxu1 %v3107_v27  ;;  %v3123_v31 = vpack.c.bf16 %v686_v26, %v685_v25  ;;  %p3454_p8 = pneg %p3453_p6  ;;  %p3460_p3 = por %p3459_p13, %p3458_p10 }
  0x64   : > { %p3461_p7 = pnand %p3460_p3, %p3454_p8 }
  0x65   : > { %2971 = vmatmul.mubr.msk.f32.gmra.mrb[2].mxu0 %vm369_vm0, %v345_v9  ;;  %3110 = vmatpush3.bf16.msra.mxu1 %v3107_v27 }
  0x66   : > { %2973 = vmatprep.mubr.msk.f32.mxu0 %vm369_vm0, %v346_v10  ;;  %3112 = vmatprep.subr.bf16.mxu1 %v3111_v30 }
  0x69   : > { %2974 = vmatmul.mubr.msk.f32.gmra.mrb[4].mxu0 %vm369_vm0, %v347_v11  ;;  %3114 = vmatpush3.bf16.msra.mxu1 %v3111_v30 }
  0x6a   : > { %2976 = vmatprep.mubr.msk.f32.mxu0 %vm369_vm0, %v348_v12  ;;  %3116 = vmatprep.subr.bf16.mxu1 %v3115_v33 }
  0x6d   : > { %2977 = vmatmul.mubr.msk.f32.gmra.mrb[6].mxu0 %vm369_vm0, %v349_v13  ;;  %3118 = vmatpush3.bf16.msra.mxu1 %v3115_v33 }
  0x6e   : > { %2979 = vmatprep.mubr.msk.f32.mxu0 %vm369_vm0, %v350_v14  ;;  %v683_v14 = vld [vmem:[%s4353_s3 + $0x40] sm:$0xff] }
  0x71   : > { %2980 = vmatmul.mubr.msk.f32.gmra.mrb[8].mxu0 %vm369_vm0, %v351_v15  ;;  %v684_v15 = vld [vmem:[%s4353_s3 + $0x48] sm:$0xff] }
  0x72   : > { %2982 = vmatprep.mubr.msk.f32.mxu0 %vm369_vm0, %v352_v16  ;;  %v3119_v16 = vpack.c.bf16 %v684_v15, %v683_v14 }
  0x74   : > { %3120 = vmatprep.subr.bf16.mxu1 %v3119_v16 }
  0x75   : > { %2983 = vmatmul.mubr.msk.f32.gmra.mrb[10].mxu0 %vm369_vm0, %v353_v17  ;;  %3122 = vmatpush3.bf16.msra.mxu1 %v3119_v16 }
  0x76   : > { %2985 = vmatprep.mubr.msk.f32.mxu0 %vm369_vm0, %v354_v18  ;;  %3124 = vmatprep.subr.bf16.mxu1 %v3123_v31 }
  0x79   : > { %2986 = vmatmul.mubr.msk.f32.gmra.mrb[12].mxu0 %vm369_vm0, %v355_v19  ;;  %3126 = vmatpush3.bf16.msra.mxu1 %v3123_v31 }
  0x7a   : > { %2988 = vmatprep.mubr.msk.f32.mxu0 %vm369_vm0, %v356_v20 }
  0x7d   : > { %2989 = vmatmul.mubr.msk.f32.gmra.mrb[14].mxu0 %vm369_vm0, %v357_v21 }
 0x134   : > { %v2969_v35 = vpop.f32.mrb[0].mxu0 }
 0x135   : > { %v484_v36 = vpop.f32.mrb[1].mxu0  ;;  %v490_v37 = vadd.f32 %v2969_v35, %v3803_v34 }
 0x136   : > { %v485_v38 = vadd.f32 %v3803_v34, %v484_v36 }
 0x137   : > { %v3810_v43 = vmax.f32 %v490_v37, 0.0  ;;  %v687_v37 = vld [vmem:[%s4353_s3 + $0x60] sm:$0xff] }
 0x138   : > { %v3807_v39 = vmax.f32 %v485_v38, 0.0  ;;  %v2972_v40 = vpop.f32.mrb[2].mxu0  ;;  %v688_v38 = vld [vmem:[%s4353_s3 + $0x68] sm:$0xff] }
 0x139   : > { %v500_v41 = vadd.f32 %v2972_v40, %v3803_v34  ;;  %v494_v42 = vpop.f32.mrb[3].mxu0  ;;  %v580_v53 = vmul.f32 %v3810_v43, %v3810_v43 }
 0x13a   : > { %v495_v44 = vadd.f32 %v3803_v34, %v494_v42  ;;  %v579_v45 = vmul.f32 %v3807_v39, %v3807_v39  ;;  %v3127_v42 = vpack.c.bf16 %v688_v38, %v687_v37 }
 0x13b   : > { %v3815_v46 = vmax.f32 %v500_v41, 0.0 }
 0x13c   : > { %v3817_v47 = vmax.f32 %v495_v44, 0.0  ;;  %v2975_v48 = vpop.f32.mrb[4].mxu0  ;;  %595 = vadd.xlane.f32.xlu0 %v579_v45  ;;  %3128 = vmatprep.subr.bf16.mxu1 %v3127_v42  ;;  %v689_v45 = vld [vmem:[%s4353_s3 + $0x70] sm:$0xff] }
 0x13d   : > { %v510_v49 = vadd.f32 %v2975_v48, %v3803_v34  ;;  %v504_v50 = vpop.f32.mrb[5].mxu0  ;;  %v582_v57 = vmul.f32 %v3815_v46, %v3815_v46  ;;  %3130 = vmatpush3.bf16.msra.mxu1 %v3127_v42  ;;  %v690_v48 = vld [vmem:[%s4353_s3 + $0x78] sm:$0xff] }
 0x13e   : > { %v505_v51 = vadd.f32 %v3803_v34, %v504_v50  ;;  %v581_v52 = vmul.f32 %v3817_v47, %v3817_v47  ;;  %v3131_v50 = vpack.c.bf16 %v690_v48, %v689_v45 }
 0x13f   : > { %v3825_v54 = vmax.f32 %v510_v49, 0.0 }
 0x140   : > { %v3827_v55 = vmax.f32 %v505_v51, 0.0  ;;  %v2978_v56 = vpop.f32.mrb[6].mxu0  ;;  %599 = vadd.xlane.f32.xlu1 %v581_v52  ;;  %597 = vadd.xlane.f32.xlu0 %v580_v53  ;;  %v3529_v51 = vmov 0.0  }
 0x141   : > { %v520_v58 = vadd.f32 %v2978_v56, %v3803_v34  ;;  %v514_v59 = vpop.f32.mrb[7].mxu0  ;;  %v584_v1 = vmul.f32 %v3825_v54, %v3825_v54  ;;  %3132 = vmatprep.subr.bf16.mxu1 %v3131_v50  ;;  %3047 = vmatprep.subr.bf16.mxu0 %v3529_v51 }
 0x142   : > { %v515_v60 = vadd.f32 %v3803_v34, %v514_v59  ;;  %v583_v61 = vmul.f32 %v3827_v55, %v3827_v55  ;;  %3134 = vmatpush3.bf16.msra.mxu1 %v3131_v50  ;;  %3049 = vmatprep.mubr.msk.bf16.mxu0 %vm3530_vm2, %v3529_v51 }
 0x143   : > { %v3835_v62 = vmax.f32 %v520_v58, 0.0  ;;  %3071 = vmatprep.subr.bf16.mxu1 %v3529_v51 }
 0x144   : > { %v3837_v63 = vmax.f32 %v515_v60, 0.0  ;;  %v2981_v0 = vpop.f32.mrb[8].mxu0  ;;  %601 = vadd.xlane.f32.xlu1 %v582_v57  ;;  %603 = vadd.xlane.f32.xlu0 %v583_v61 }
 0x145   : > { %v530_v2 = vadd.f32 %v2981_v0, %v3803_v34  ;;  %v524_v3 = vpop.f32.mrb[9].mxu0  ;;  %v586_v9 = vmul.f32 %v3835_v62, %v3835_v62 }
 0x146   : > { %v525_v4 = vadd.f32 %v3803_v34, %v524_v3  ;;  %v585_v5 = vmul.f32 %v3837_v63, %v3837_v63 }
 0x147   : > { %v3845_v6 = vmax.f32 %v530_v2, 0.0 }
 0x148   : > { %v3847_v7 = vmax.f32 %v525_v4, 0.0  ;;  %v2984_v8 = vpop.f32.mrb[10].mxu0  ;;  %605 = vadd.xlane.f32.xlu1 %v584_v1  ;;  %607 = vadd.xlane.f32.xlu0 %v585_v5 }
 0x149   : > { %v540_v10 = vadd.f32 %v2984_v8, %v3803_v34  ;;  %v534_v11 = vpop.f32.mrb[11].mxu0  ;;  %v588_v20 = vmul.f32 %v3845_v6, %v3845_v6 }
 0x14a   : > { %v535_v12 = vadd.f32 %v3803_v34, %v534_v11  ;;  %v587_v13 = vmul.f32 %v3847_v7, %v3847_v7 }
 0x14b   : > { %v3861_v17 = vmax.f32 %v540_v10, 0.0 }
 0x14c   : > { %v3863_v18 = vmax.f32 %v535_v12, 0.0  ;;  %v2987_v19 = vpop.f32.mrb[12].mxu0  ;;  %609 = vadd.xlane.f32.xlu1 %v586_v9  ;;  %611 = vadd.xlane.f32.xlu0 %v587_v13 }
 0x14d   : > { %v550_v21 = vadd.f32 %v2987_v19, %v3803_v34  ;;  %v544_v22 = vpop.f32.mrb[13].mxu0  ;;  %v590_v30 = vmul.f32 %v3861_v17, %v3861_v17 }
 0x14e   : > { %v545_v23 = vadd.f32 %v3803_v34, %v544_v22  ;;  %v589_v24 = vmul.f32 %v3863_v18, %v3863_v18 }
 0x14f   : > { %v3877_v27 = vmax.f32 %v550_v21, 0.0 }
 0x150   : > { %v3879_v28 = vmax.f32 %v545_v23, 0.0  ;;  %v2990_v29 = vpop.f32.mrb[14].mxu0  ;;  %613 = vadd.xlane.f32.xlu1 %v588_v20  ;;  %615 = vadd.xlane.f32.xlu0 %v589_v24 }
 0x151   : > { %v560_v32 = vadd.f32 %v2990_v29, %v3803_v34  ;;  %v554_v33 = vpop.f32.mrb[15].mxu0 }
 0x152   : > { %v555_v35 = vadd.f32 %v3803_v34, %v554_v33  ;;  %v591_v36 = vmul.f32 %v3879_v28, %v3879_v28  ;;  %v592_v34 = vmul.f32 %v3877_v27, %v3877_v27 }
 0x153   : > { %v3893_v40 = vmax.f32 %v560_v32, 0.0 }
 0x154   : > { %v3895_v41 = vmax.f32 %v555_v35, 0.0  ;;  %617 = vadd.xlane.f32.xlu1 %v590_v30  ;;  %619 = vadd.xlane.f32.xlu0 %v591_v36 }
 0x155   : > { %v594_v49 = vmul.f32 %v3893_v40, %v3893_v40 }
 0x156   : > { %v593_v44 = vmul.f32 %v3895_v41, %v3895_v41 }
 0x158   : > { %621 = vadd.xlane.f32.xlu1 %v592_v34  ;;  %623 = vadd.xlane.f32.xlu0 %v593_v44 }
 0x15c   : > { %625 = vadd.xlane.f32.xlu1 %v594_v49 }
 0x1c9   : > { %v596_v52 = vpop.xlane.xlu0 %595 }
 0x1ca   : > { %v627_v53 = vmax.f32 %v596_v52, 1e-24 }
 0x1cc   : > { %3265 = vrsqrt.f32 %v627_v53 }
 0x1cd   : > { %v600_v56 = vpop.xlane.xlu1 %599  ;;  %v598_v57 = vpop.xlane.xlu0 %597 }
 0x1ce   : > { %v629_v58 = vmax.f32 %v600_v56, 1e-24  ;;  %v628_v59 = vmax.f32 %v598_v57, 1e-24 }
 0x1d0   : > { %3267 = vrsqrt.f32 %v629_v58 }
 0x1d1   : > { %3269 = vrsqrt.f32 %v628_v59  ;;  %v602_v60 = vpop.xlane.xlu1 %601  ;;  %v604_v61 = vpop.xlane.xlu0 %603 }
 0x1d2   : > { %v630_v0 = vmax.f32 %v602_v60, 1e-24  ;;  %v631_v1 = vmax.f32 %v604_v61, 1e-24 }
 0x1d4   : > { %3271 = vrsqrt.f32 %v630_v0 }
 0x1d5   : > { %3273 = vrsqrt.f32 %v631_v1  ;;  %v606_v2 = vpop.xlane.xlu1 %605  ;;  %v608_v3 = vpop.xlane.xlu0 %607 }
 0x1d6   : > { %v3266_v4 = vpop.eup %3265  ;;  %v632_v5 = vmax.f32 %v606_v2, 1e-24  ;;  %v633_v8 = vmax.f32 %v608_v3, 1e-24 }
 0x1d7   : > { %v659_v9 = vmul.f32 %v3266_v4, %v3807_v39 }
 0x1d8   : > { %3275 = vrsqrt.f32 %v632_v5 }
 0x1d9   : > { %3277 = vrsqrt.f32 %v633_v8  ;;  %v610_v10 = vpop.xlane.xlu1 %609  ;;  %3023 = vmatprep.mubr.f32.mxu1 %v659_v9  ;;  %v612_v11 = vpop.xlane.xlu0 %611 }
 0x1da   : > { %v3268_v12 = vpop.eup %3267  ;;  %v634_v13 = vmax.f32 %v610_v10, 1e-24  ;;  %v635_v14 = vmax.f32 %v612_v11, 1e-24 }
 0x1db   : > { %v3270_v15 = vpop.eup %3269  ;;  %v3913_v16 = vmul.f32 %v3268_v12, %v3817_v47 }
 0x1dc   : > { %3279 = vrsqrt.f32 %v634_v13  ;;  %v660_v19 = vmul.f32 %v3270_v15, %v3810_v43 }
 0x1dd   : > { %3281 = vrsqrt.f32 %v635_v14  ;;  %v614_v20 = vpop.xlane.xlu1 %613  ;;  %v616_v21 = vpop.xlane.xlu0 %615 }
 0x1de   : > { %v3272_v22 = vpop.eup %3271  ;;  %v1028_v39 = vpack.c.bf16 %v660_v19, %v659_v9  ;;  %v636_v23 = vmax.f32 %v614_v20, 1e-24  ;;  %3024 = vmatmul.mubr.f32.vlgmr.msra.gmra.mrb[0].mxu1 %v660_v19  ;;  %v637_v24 = vmax.f32 %v616_v21, 1e-24 }
 0x1df   : > { %v3274_v25 = vpop.eup %3273  ;;  %3026 = vmatprep.mubr.f32.mxu1 %v3913_v16  ;;  %v3918_v26 = vmul.f32 %v3272_v22, %v3815_v46 }
 0x1e0   : > { %3283 = vrsqrt.f32 %v636_v23  ;;  %3048 = vmatpush3.bf16.msra.mxu0 %v1028_v39  ;;  %v3921_v47 = vmul.f32 %v3274_v25, %v3827_v55 }
 0x1e1   : > { %3285 = vrsqrt.f32 %v637_v24  ;;  %v618_v43 = vpop.xlane.xlu1 %617  ;;  %v1029_v29 = vpack.c.bf16 %v3918_v26, %v3913_v16  ;;  %v620_v30 = vpop.xlane.xlu0 %619  ;;  %3053 = vmatprep.subr.bf16.mxu0 %v3529_v51 }
 0x1e2   : > { %v3276_v31 = vpop.eup %3275  ;;  %v638_v32 = vmax.f32 %v618_v43, 1e-24  ;;  %3027 = vmatmul.mubr.f32.gmra.mrb[2].mxu1 %v3918_v26  ;;  %v639_v33 = vmax.f32 %v620_v30, 1e-24 }
 0x1e3   : > { %v3278_v46 = vpop.eup %3277  ;;  %3029 = vmatprep.mubr.f32.mxu1 %v3921_v47  ;;  %v3929_v35 = vmul.f32 %v3276_v31, %v3825_v54 }
 0x1e4   : > { %3287 = vrsqrt.f32 %v638_v32  ;;  %v3932_v55 = vmul.f32 %v3278_v46, %v3837_v63 }
 0x1e5   : > { %3289 = vrsqrt.f32 %v639_v33  ;;  %v622_v36 = vpop.xlane.xlu1 %621  ;;  %v1030_v37 = vpack.c.bf16 %v3929_v35, %v3921_v47  ;;  %v624_v38 = vpop.xlane.xlu0 %623 }
 0x1e6   : > { %v3280_v34 = vpop.eup %3279  ;;  %v640_v42 = vmax.f32 %v622_v36, 1e-24  ;;  %3030 = vmatmul.mubr.f32.gmra.mrb[4].mxu1 %v3929_v35  ;;  %v641_v44 = vmax.f32 %v624_v38, 1e-24 }
 0x1e7   : > { %v3282_v45 = vpop.eup %3281  ;;  %3032 = vmatprep.mubr.f32.mxu1 %v3932_v55  ;;  %v3939_v54 = vmul.f32 %v3280_v34, %v3835_v62 }
 0x1e8   : > { %3291 = vrsqrt.f32 %v640_v42  ;;  %v667_v63 = vmul.f32 %v3282_v45, %v3847_v7 }
 0x1e9   : > { %3293 = vrsqrt.f32 %v641_v44  ;;  %v626_v48 = vpop.xlane.xlu1 %625  ;;  %v1031_v49 = vpack.c.bf16 %v3939_v54, %v3932_v55  ;;  %v4205_v55 = vld [vmem:[%s4355_s5] sm:$0xff] }
 0x1ea   : > { %v3284_v50 = vpop.eup %3283  ;;  %v642_v52 = vmax.f32 %v626_v48, 1e-24  ;;  %3033 = vmatmul.mubr.f32.gmra.mrb[6].mxu1 %v3939_v54 }
 0x1eb   : > { %v3286_v53 = vpop.eup %3285  ;;  %3035 = vmatprep.mubr.f32.mxu1 %v667_v63  ;;  %v668_v56 = vmul.f32 %v3284_v50, %v3845_v6 }
 0x1ec   : > { %3295 = vrsqrt.f32 %v642_v52  ;;  %v3947_v62 = vmul.f32 %v3286_v53, %v3863_v18 }
 0x1ed   : > { %v1032_v57 = vpack.c.bf16 %v668_v56, %v667_v63 }
 0x1ee   : > { %v3288_v58 = vpop.eup %3287  ;;  %3036 = vmatmul.mubr.f32.gmra.mrb[8].mxu1 %v668_v56 }
 0x1ef   : > { %v3290_v7 = vpop.eup %3289  ;;  %3038 = vmatprep.mubr.f32.mxu1 %v3947_v62  ;;  %3072 = vmatpush3.bf16.msra.mxu1 %v1032_v57  ;;  %v3951_v59 = vmul.f32 %v3288_v58, %v3861_v17 }
 0x1f0   : > { %v3954_v60 = vmul.f32 %v3290_v7, %v3879_v28  ;;  %3083 = vmatprep.subr.bf16.mxu1 %v3529_v51 }
 0x1f1   : > { %v1033_v6 = vpack.c.bf16 %v3951_v59, %v3947_v62 }
 0x1f2   : > { %v3292_v18 = vpop.eup %3291  ;;  %3039 = vmatmul.mubr.f32.gmra.mrb[10].mxu1 %v3951_v59 }
 0x1f3   : > { %v3294_v61 = vpop.eup %3293  ;;  %3041 = vmatprep.mubr.f32.mxu1 %v3954_v60  ;;  %v3962_v0 = vmul.f32 %v3292_v18, %v3877_v27  ;;  %v2723_v27 = vld [vmem:[%s4354_s4] ss:$0 sm:$0xff] }
 0x1f4   : > { %v3965_v17 = vmul.f32 %v3294_v61, %v3895_v41 }
 0x1f5   : > { %v1034_v28 = vpack.c.bf16 %v3962_v0, %v3954_v60 }
 0x1f6   : > { %v3296_v1 = vpop.eup %3295  ;;  %3042 = vmatmul.mubr.f32.gmra.mrb[12].mxu1 %v3962_v0 }
 0x1f7   : > { %3044 = vmatprep.mubr.f32.mxu1 %v3965_v17  ;;  %v3972_v2 = vmul.f32 %v3296_v1, %v3893_v40 }
 0x1f9   : > { %v1035_v3 = vpack.c.bf16 %v3972_v2, %v3965_v17 }
 0x1fa   : > { %3045 = vmatmul.mubr.f32.gmra.mrb[14].mxu1 %v3972_v2 }
 0x1fb   : > { %3073 = vmatprep.mubr.msk.bf16.mxu1 %vm3530_vm2, %v3529_v51 }
 0x2b1   : > { %v3025_v41 = vpop.f32.mrb[0].mxu1 }
 0x2b2   : > { %v3980_v4 = vadd.f32 %v3025_v41, %v2723_v27  ;;  %v764_v5 = vpop.f32.mrb[1].mxu1 }
 0x2b3   : > { %v3982_v8 = vadd.f32 %v2723_v27, %v764_v5 }
 0x2b4   : > { %v847_v40 = vsel %vm843_vm1, %v3980_v4, -inf }
 0x2b5   : > { %848 = vmax.xlane.f32.xlu1 %v847_v40  ;;  %v3028_v9 = vpop.f32.mrb[2].mxu1  ;;  %v844_v10 = vsel %vm843_vm1, %v3982_v8, -inf }
 0x2b6   : > { %v3988_v11 = vadd.f32 %v3028_v9, %v2723_v27  ;;  %v774_v12 = vpop.f32.mrb[3].mxu1  ;;  %845 = vmax.xlane.f32.xlu0 %v844_v10 }
 0x2b7   : > { %v3990_v13 = vadd.f32 %v2723_v27, %v774_v12 }
 0x2b8   : > { %v853_v14 = vsel %vm843_vm1, %v3988_v11, -inf }
 0x2b9   : > { %854 = vmax.xlane.f32.xlu1 %v853_v14  ;;  %v3031_v15 = vpop.f32.mrb[4].mxu1  ;;  %v850_v19 = vsel %vm843_vm1, %v3990_v13, -inf }
 0x2ba   : > { %v3996_v20 = vadd.f32 %v3031_v15, %v2723_v27  ;;  %851 = vmax.xlane.f32.xlu0 %v850_v19  ;;  %v784_v21 = vpop.f32.mrb[5].mxu1 }
 0x2bb   : > { %v3998_v22 = vadd.f32 %v2723_v27, %v784_v21 }
 0x2bc   : > { %v859_v39 = vsel %vm843_vm1, %v3996_v20, -inf }
 0x2bd   : > { %860 = vmax.xlane.f32.xlu1 %v859_v39  ;;  %v3034_v23 = vpop.f32.mrb[6].mxu1  ;;  %v856_v24 = vsel %vm843_vm1, %v3998_v22, -inf }
 0x2be   : > { %v4004_v25 = vadd.f32 %v3034_v23, %v2723_v27  ;;  %857 = vmax.xlane.f32.xlu0 %v856_v24  ;;  %v794_v43 = vpop.f32.mrb[7].mxu1 }
 0x2bf   : > { %v4006_v30 = vadd.f32 %v2723_v27, %v794_v43 }
 0x2c0   : > { %v865_v31 = vsel %vm843_vm1, %v4004_v25, -inf }
 0x2c1   : > { %866 = vmax.xlane.f32.xlu1 %v865_v31  ;;  %v3037_v32 = vpop.f32.mrb[8].mxu1  ;;  %v862_v33 = vsel %vm843_vm1, %v4006_v30, -inf }
 0x2c2   : > { %v4012_v46 = vadd.f32 %v3037_v32, %v2723_v27  ;;  %863 = vmax.xlane.f32.xlu0 %v862_v33  ;;  %v804_v36 = vpop.f32.mrb[9].mxu1 }
 0x2c3   : > { %v4014_v38 = vadd.f32 %v2723_v27, %v804_v36 }
 0x2c4   : > { %v871_v34 = vsel %vm843_vm1, %v4012_v46, -inf }
 0x2c5   : > { %872 = vmax.xlane.f32.xlu1 %v871_v34  ;;  %v3040_v42 = vpop.f32.mrb[10].mxu1  ;;  %v868_v44 = vsel %vm843_vm1, %v4014_v38, -inf }
 0x2c6   : > { %v4020_v45 = vadd.f32 %v3040_v42, %v2723_v27  ;;  %869 = vmax.xlane.f32.xlu0 %v868_v44  ;;  %v814_v63 = vpop.f32.mrb[11].mxu1 }
 0x2c7   : > { %v4022_v48 = vadd.f32 %v2723_v27, %v814_v63 }
 0x2c8   : > { %v877_v50 = vsel %vm843_vm1, %v4020_v45, -inf }
 0x2c9   : > { %878 = vmax.xlane.f32.xlu1 %v877_v50  ;;  %v3043_v52 = vpop.f32.mrb[12].mxu1  ;;  %v874_v53 = vsel %vm843_vm1, %v4022_v48, -inf }
 0x2ca   : > { %v4028_v56 = vadd.f32 %v3043_v52, %v2723_v27  ;;  %875 = vmax.xlane.f32.xlu0 %v874_v53  ;;  %v824_v57 = vpop.f32.mrb[13].mxu1 }
 0x2cb   : > { %v4030_v58 = vadd.f32 %v2723_v27, %v824_v57 }
 0x2cc   : > { %v883_v7 = vsel %vm843_vm1, %v4028_v56, -inf }
 0x2cd   : > { %884 = vmax.xlane.f32.xlu1 %v883_v7  ;;  %v3046_v18 = vpop.f32.mrb[14].mxu1  ;;  %v880_v61 = vsel %vm843_vm1, %v4030_v58, -inf }
 0x2ce   : > { %v4036_v1 = vadd.f32 %v3046_v18, %v2723_v27  ;;  %881 = vmax.xlane.f32.xlu0 %v880_v61  ;;  %v834_v41 = vpop.f32.mrb[15].mxu1 }
 0x2cf   : > { %v4038_v5 = vadd.f32 %v2723_v27, %v834_v41 }
 0x2d0   : > { %v889_v40 = vsel %vm843_vm1, %v4036_v1, -inf }
 0x2d1   : > { %890 = vmax.xlane.f32.xlu1 %v889_v40  ;;  %v886_v9 = vsel %vm843_vm1, %v4038_v5, -inf }
 0x2d2   : > { %887 = vmax.xlane.f32.xlu0 %v886_v9 }
 0x342   : > { %v849_v10 = vpop.xlane.xlu1 %848 }
 0x343   : > { %v893_v12 = vsub.f32 %v3980_v4, %v849_v10  ;;  %v846_v14 = vpop.xlane.xlu0 %845 }
 0x344   : > { %v892_v15 = vsub.f32 %v3982_v8, %v846_v14 }
 0x345   : > { %v910_v19 = vmul.f32 1.442695, %v893_v12 }
 0x346   : > { %v908_v21 = vmul.f32 1.442695, %v892_v15  ;;  %v855_v39 = vpop.xlane.xlu1 %854 }
 0x347   : > { %3297 = vpow2.f32 %v910_v19  ;;  %v895_v27 = vsub.f32 %v3988_v11, %v855_v39  ;;  %v852_v23 = vpop.xlane.xlu0 %851 }
 0x348   : > { %3299 = vpow2.f32 %v908_v21  ;;  %v894_v24 = vsub.f32 %v3990_v13, %v852_v23 }
 0x349   : > { %v914_v43 = vmul.f32 1.442695, %v895_v27 }
 0x34a   : > { %v912_v31 = vmul.f32 1.442695, %v894_v24  ;;  %v861_v32 = vpop.xlane.xlu1 %860 }
 0x34b   : > { %3301 = vpow2.f32 %v914_v43  ;;  %v897_v33 = vsub.f32 %v3996_v20, %v861_v32  ;;  %v858_v4 = vpop.xlane.xlu0 %857 }
 0x34c   : > { %3303 = vpow2.f32 %v912_v31  ;;  %v896_v8 = vsub.f32 %v3998_v22, %v858_v4 }
 0x34d   : > { %v918_v36 = vmul.f32 1.442695, %v897_v33 }
 0x34e   : > { %v916_v34 = vmul.f32 1.442695, %v896_v8  ;;  %v867_v42 = vpop.xlane.xlu1 %866 }
 0x34f   : > { %3305 = vpow2.f32 %v918_v36  ;;  %v899_v11 = vsub.f32 %v4004_v25, %v867_v42  ;;  %v864_v44 = vpop.xlane.xlu0 %863 }
 0x350   : > { %3307 = vpow2.f32 %v916_v34  ;;  %v898_v13 = vsub.f32 %v4006_v30, %v864_v44 }
 0x351   : > { %v4052_v63 = vpop.eup %3297  ;;  %v922_v50 = vmul.f32 1.442695, %v899_v11 }
 0x352   : > { %v4054_v52 = vpop.eup %3299  ;;  %v920_v20 = vmul.f32 1.442695, %v898_v13  ;;  %v873_v53 = vpop.xlane.xlu1 %872  ;;  %v943_v22 = vsel %vm843_vm1, %v4052_v63, 0.0 }
 0x353   : > { %3309 = vpow2.f32 %v922_v50  ;;  %v901_v57 = vsub.f32 %v4012_v46, %v873_v53  ;;  %944 = vadd.xlane.f32.xlu1 %v943_v22  ;;  %v870_v7 = vpop.xlane.xlu0 %869  ;;  %v940_v25 = vsel %vm843_vm1, %v4054_v52, 0.0 }
 0x354   : > { %3311 = vpow2.f32 %v920_v20  ;;  %v900_v30 = vsub.f32 %v4014_v38, %v870_v7  ;;  %941 = vadd.xlane.f32.xlu0 %v940_v25 }
 0x355   : > { %v4062_v18 = vpop.eup %3301  ;;  %v926_v61 = vmul.f32 1.442695, %v901_v57 }
 0x356   : > { %v4064_v41 = vpop.eup %3303  ;;  %v924_v40 = vmul.f32 1.442695, %v900_v30  ;;  %v879_v9 = vpop.xlane.xlu1 %878  ;;  %v949_v10 = vsel %vm843_vm1, %v4062_v18, 0.0 }
 0x357   : > { %3313 = vpow2.f32 %v926_v61  ;;  %v903_v46 = vsub.f32 %v4020_v45, %v879_v9  ;;  %950 = vadd.xlane.f32.xlu1 %v949_v10  ;;  %v876_v12 = vpop.xlane.xlu0 %875  ;;  %v946_v14 = vsel %vm843_vm1, %v4064_v41, 0.0 }
 0x358   : > { %3315 = vpow2.f32 %v924_v40  ;;  %v902_v38 = vsub.f32 %v4022_v48, %v876_v12  ;;  %947 = vadd.xlane.f32.xlu0 %v946_v14 }
 0x359   : > { %v4072_v15 = vpop.eup %3305  ;;  %v930_v19 = vmul.f32 1.442695, %v903_v46 }
 0x35a   : > { %v4074_v21 = vpop.eup %3307  ;;  %v928_v39 = vmul.f32 1.442695, %v902_v38  ;;  %v885_v27 = vpop.xlane.xlu1 %884  ;;  %v955_v23 = vsel %vm843_vm1, %v4072_v15, 0.0 }
 0x35b   : > { %3317 = vpow2.f32 %v930_v19  ;;  %v905_v45 = vsub.f32 %v4028_v56, %v885_v27  ;;  %956 = vadd.xlane.f32.xlu1 %v955_v23  ;;  %v882_v24 = vpop.xlane.xlu0 %881  ;;  %v952_v43 = vsel %vm843_vm1, %v4074_v21, 0.0 }
 0x35c   : > { %3319 = vpow2.f32 %v928_v39  ;;  %v904_v48 = vsub.f32 %v4030_v58, %v882_v24  ;;  %953 = vadd.xlane.f32.xlu0 %v952_v43 }
 0x35d   : > { %v4082_v31 = vpop.eup %3309  ;;  %v934_v32 = vmul.f32 1.442695, %v905_v45 }
 0x35e   : > { %v4084_v33 = vpop.eup %3311  ;;  %v932_v4 = vmul.f32 1.442695, %v904_v48  ;;  %v891_v8 = vpop.xlane.xlu1 %890  ;;  %v961_v36 = vsel %vm843_vm1, %v4082_v31, 0.0 }
 0x35f   : > { %3321 = vpow2.f32 %v934_v32  ;;  %v907_v56 = vsub.f32 %v4036_v1, %v891_v8  ;;  %962 = vadd.xlane.f32.xlu1 %v961_v36  ;;  %v888_v34 = vpop.xlane.xlu0 %887  ;;  %v958_v42 = vsel %vm843_vm1, %v4084_v33, 0.0 }
 0x360   : > { %3323 = vpow2.f32 %v932_v4  ;;  %v906_v58 = vsub.f32 %v4038_v5, %v888_v34  ;;  %959 = vadd.xlane.f32.xlu0 %v958_v42 }
 0x361   : > { %v4092_v11 = vpop.eup %3313  ;;  %v938_v44 = vmul.f32 1.442695, %v907_v56 }
 0x362   : > { %v4094_v13 = vpop.eup %3315  ;;  %v936_v50 = vmul.f32 1.442695, %v906_v58  ;;  %v967_v20 = vsel %vm843_vm1, %v4092_v11, 0.0 }
 0x363   : > { %3325 = vpow2.f32 %v938_v44  ;;  %968 = vadd.xlane.f32.xlu1 %v967_v20  ;;  %v964_v1 = vsel %vm843_vm1, %v4094_v13, 0.0 }
 0x364   : > { %3327 = vpow2.f32 %v936_v50  ;;  %965 = vadd.xlane.f32.xlu0 %v964_v1 }
 0x365   : > { %v4100_v53 = vpop.eup %3317 }
 0x366   : > { %v4102_v5 = vpop.eup %3319  ;;  %v973_v22 = vsel %vm843_vm1, %v4100_v53, 0.0 }
 0x367   : > { %974 = vadd.xlane.f32.xlu1 %v973_v22  ;;  %v970_v57 = vsel %vm843_vm1, %v4102_v5, 0.0 }
 0x368   : > { %971 = vadd.xlane.f32.xlu0 %v970_v57 }
 0x369   : > { %v4108_v7 = vpop.eup %3321 }
 0x36a   : > { %v4110_v25 = vpop.eup %3323  ;;  %v979_v30 = vsel %vm843_vm1, %v4108_v7, 0.0 }
 0x36b   : > { %980 = vadd.xlane.f32.xlu1 %v979_v30  ;;  %v976_v61 = vsel %vm843_vm1, %v4110_v25, 0.0 }
 0x36c   : > { %977 = vadd.xlane.f32.xlu0 %v976_v61 }
 0x36d   : > { %v4116_v40 = vpop.eup %3325 }
 0x36e   : > { %v4118_v9 = vpop.eup %3327  ;;  %v985_v10 = vsel %vm843_vm1, %v4116_v40, 0.0 }
 0x36f   : > { %986 = vadd.xlane.f32.xlu1 %v985_v10  ;;  %v982_v46 = vsel %vm843_vm1, %v4118_v9, 0.0 }
 0x370   : > { %983 = vadd.xlane.f32.xlu0 %v982_v46 }
 0x3e0   : > { %v945_v12 = vpop.xlane.xlu1 %944 }
 0x3e1   : > { %3329 = vrcp.f32 %v945_v12  ;;  %v942_v14 = vpop.xlane.xlu0 %941 }
 0x3e2   : > { %3331 = vrcp.f32 %v942_v14 }
 0x3e4   : > { %v951_v38 = vpop.xlane.xlu1 %950 }
 0x3e5   : > { %3333 = vrcp.f32 %v951_v38  ;;  %v948_v19 = vpop.xlane.xlu0 %947 }
 0x3e6   : > { %3335 = vrcp.f32 %v948_v19 }
 0x3e8   : > { %v957_v39 = vpop.xlane.xlu1 %956 }
 0x3e9   : > { %3337 = vrcp.f32 %v957_v39  ;;  %v954_v27 = vpop.xlane.xlu0 %953 }
 0x3ea   : > { %3339 = vrcp.f32 %v954_v27 }
 0x3eb   : > { %v3330_v23 = vpop.eup %3329 }
 0x3ec   : > { %v3332_v45 = vpop.eup %3331  ;;  %v963_v24 = vpop.xlane.xlu1 %962  ;;  %v1005_v43 = vmul.f32 %v3330_v23, %v4052_v63 }
 0x3ed   : > { %3341 = vrcp.f32 %v963_v24  ;;  %v960_v48 = vpop.xlane.xlu0 %959  ;;  %v1004_v32 = vmul.f32 %v3332_v45, %v4054_v52 }
 0x3ee   : > { %3343 = vrcp.f32 %v960_v48 }
 0x3ef   : > { %v3334_v4 = vpop.eup %3333  ;;  %v1020_v8 = vpack.c.bf16 %v1005_v43, %v1004_v32  ;;  %v1509_v57 = vsel %vm843_vm1, %v1004_v32, 0.0 }
 0x3f0   : > { %v3336_v36 = vpop.eup %3335  ;;  %v969_v56 = vpop.xlane.xlu1 %968  ;;  %v1007_v34 = vmul.f32 %v3334_v4, %v4062_v18  ;;  %v1510_v18 = vsel %vm843_vm1, %v1005_v43, 0.0 }
 0x3f1   : > { %3345 = vrcp.f32 %v969_v56  ;;  %1036 = vxpose.xlu0.c.b16.start.end [1/1] (short) (narrow) %v1020_v8, 16  ;;  %v966_v42 = vpop.xlane.xlu0 %965  ;;  %v1006_v58 = vmul.f32 %v3336_v36, %v4064_v41  ;;  %v1511_v19 = vadd.f32 %v1510_v18, %v1509_v57 }
 0x3f2   : > { %3347 = vrcp.f32 %v966_v42  ;;  %v1519_v20 = vsel %vm843_vm1, %v1007_v34, 0.0 }
 0x3f3   : > { %v3338_v44 = vpop.eup %3337  ;;  %v1021_v50 = vpack.c.bf16 %v1007_v34, %v1006_v58  ;;  %v1518_v63 = vsel %vm843_vm1, %v1006_v58, 0.0  ;;  %v1512_v56 = vrot.slane %v1511_v19, 4 }
 0x3f4   : > { %v3340_v52 = vpop.eup %3339  ;;  %v975_v1 = vpop.xlane.xlu1 %974  ;;  %v1009_v22 = vmul.f32 %v3338_v44, %v4072_v15  ;;  %v1520_v61 = vadd.f32 %v1519_v20, %v1518_v63 }
 0x3f5   : > { %3349 = vrcp.f32 %v975_v1  ;;  %1096 = vxpose.xlu1.c.b16.start.end [1/1] (short) (narrow) %v1021_v50, 16  ;;  %v972_v30 = vpop.xlane.xlu0 %971  ;;  %v1008_v41 = vmul.f32 %v3340_v52, %v4074_v21 }
 0x3f6   : > { %3351 = vrcp.f32 %v972_v30  ;;  %v1528_v14 = vsel %vm843_vm1, %v1009_v22, 0.0  ;;  %v1521_v21 = vrot.slane %v1520_v61, 4 }
 0x3f7   : > { %v3342_v10 = vpop.eup %3341  ;;  %v1022_v46 = vpack.c.bf16 %v1009_v22, %v1008_v41  ;;  %v1527_v12 = vsel %vm843_vm1, %v1008_v41, 0.0  ;;  %v1513_v22 = vadd.f32 %v1512_v56, %v1511_v19 }
 0x3f8   : > { %v3344_v38 = vpop.eup %3343  ;;  %v981_v15 = vpop.xlane.xlu1 %980  ;;  %v1011_v39 = vmul.f32 %v3342_v10, %v4082_v31  ;;  %v1529_v45 = vadd.f32 %v1528_v14, %v1527_v12  ;;  %v1522_v42 = vadd.f32 %v1521_v21, %v1520_v61 }
 0x3f9   : > { %3353 = vrcp.f32 %v981_v15  ;;  %1155 = vxpose.xlu0.c.b16.start.end [1/1] (short) (narrow) %v1022_v46, 16  ;;  %v978_v27 = vpop.xlane.xlu0 %977  ;;  %v1010_v23 = vmul.f32 %v3344_v38, %v4084_v33 }
 0x3fa   : > { %3355 = vrcp.f32 %v978_v27  ;;  %v1537_v8 = vsel %vm843_vm1, %v1011_v39, 0.0  ;;  %v1530_v58 = vrot.slane %v1529_v45, 4  ;;  %v1523_v18 = vrot.slane %v1522_v42, 2 }
 0x3fb   : > { %v3346_v24 = vpop.eup %3345  ;;  %v1023_v43 = vpack.c.bf16 %v1011_v39, %v1010_v23  ;;  %v1536_v4 = vsel %vm843_vm1, %v1010_v23, 0.0  ;;  %v1514_v39 = vrot.slane %v1513_v22, 2 }
 0x3fc   : > { %v3348_v48 = vpop.eup %3347  ;;  %v987_v32 = vpop.xlane.xlu1 %986  ;;  %v1013_v36 = vmul.f32 %v3346_v24, %v4092_v11  ;;  %v1538_v50 = vadd.f32 %v1537_v8, %v1536_v4  ;;  %v1531_v30 = vadd.f32 %v1530_v58, %v1529_v45  ;;  %v1524_v27 = vadd.f32 %v1523_v18, %v1522_v42 }
 0x3fd   : > { %3357 = vrcp.f32 %v987_v32  ;;  %1214 = vxpose.xlu1.c.b16.start.end [1/1] (short) (narrow) %v1023_v43, 16  ;;  %v984_v31 = vpop.xlane.xlu0 %983  ;;  %v1012_v34 = vmul.f32 %v3348_v48, %v4094_v13 }
 0x3fe   : > { %3359 = vrcp.f32 %v984_v31  ;;  %v1546_v33 = vsel %vm843_vm1, %v1013_v36, 0.0  ;;  %v1539_v12 = vrot.slane %v1538_v50, 4  ;;  %v1532_v23 = vrot.slane %v1531_v30, 2 }
 0x3ff   : > { %v3350_v44 = vpop.eup %3349  ;;  %v1024_v63 = vpack.c.bf16 %v1013_v36, %v1012_v34  ;;  %v1545_v20 = vsel %vm843_vm1, %v1012_v34, 0.0  ;;  %v1525_v31 = vrot.slane %v1524_v27, 1 }
 0x400   : > { %v3352_v52 = vpop.eup %3351  ;;  %v1547_v1 = vadd.f32 %v1546_v33, %v1545_v20  ;;  %v1015_v11 = vmul.f32 %v3350_v44, %v4100_v53  ;;  %v1540_v43 = vadd.f32 %v1539_v12, %v1538_v50  ;;  %v1533_v34 = vadd.f32 %v1532_v23, %v1531_v30 }
 0x401   : > { %1273 = vxpose.xlu0.c.b16.start.end [1/1] (short) (narrow) %v1024_v63, 16  ;;  %v1014_v57 = vmul.f32 %v3352_v52, %v4102_v5 }
 0x402   : > { %v1555_v13 = vsel %vm843_vm1, %v1015_v11, 0.0  ;;  %v1548_v41 = vrot.slane %v1547_v1, 4  ;;  %v1541_v44 = vrot.slane %v1540_v43, 2 }
 0x403   : > { %v3354_v61 = vpop.eup %3353  ;;  %v1025_v10 = vpack.c.bf16 %v1015_v11, %v1014_v57  ;;  %v1554_v46 = vsel %vm843_vm1, %v1014_v57, 0.0  ;;  %v1534_v57 = vrot.slane %v1533_v34, 1 }
 0x404   : > { %v3356_v14 = vpop.eup %3355  ;;  %v1556_v38 = vadd.f32 %v1555_v13, %v1554_v46  ;;  %v1017_v15 = vmul.f32 %v3354_v61, %v4108_v7  ;;  %v1549_v53 = vadd.f32 %v1548_v41, %v1547_v1  ;;  %v1515_v7 = vadd.f32 %v1514_v39, %v1513_v22 }
 0x405   : > { %1332 = vxpose.xlu1.c.b16.start.end [1/1] (short) (narrow) %v1025_v10, 16  ;;  %v1016_v19 = vmul.f32 %v3356_v14, %v4110_v25  ;;  %v1526_v22 = vadd.f32 %v1525_v31, %v1524_v27  ;;  %v1535_v10 = vadd.f32 %v1534_v57, %v1533_v34 }
 0x406   : > { %v1564_v5 = vsel %vm843_vm1, %v1017_v15, 0.0  ;;  %v1557_v48 = vrot.slane %v1556_v38, 4  ;;  %v1550_v36 = vrot.slane %v1549_v53, 2  ;;  %v1516_v20 = vrot.slane %v1515_v7, 1 }
 0x407   : > { %v3358_v45 = vpop.eup %3357  ;;  %v1026_v21 = vpack.c.bf16 %v1017_v15, %v1016_v19  ;;  %v1563_v24 = vsel %vm843_vm1, %v1016_v19, 0.0 }
 0x408   : > { %v3360_v32 = vpop.eup %3359  ;;  %v1565_v4 = vadd.f32 %v1564_v5, %v1563_v24  ;;  %v1019_v8 = vmul.f32 %v3358_v45, %v4116_v40  ;;  %v1558_v50 = vadd.f32 %v1557_v48, %v1556_v38  ;;  %v1551_v52 = vadd.f32 %v1550_v36, %v1549_v53 }
 0x409   : > { %1391 = vxpose.xlu0.c.b16.start.end [1/1] (short) (narrow) %v1026_v21, 16  ;;  %v1018_v56 = vmul.f32 %v3360_v32, %v4118_v9  ;;  %v1542_v9 = vadd.f32 %v1541_v44, %v1540_v43  ;;  %v1517_v18 = vadd.f32 %v1516_v20, %v1515_v7 }
 0x40a   : > { %v1573_v25 = vsel %vm843_vm1, %v1019_v8, 0.0  ;;  %v1566_v33 = vrot.slane %v1565_v4, 4  ;;  %v1559_v13 = vrot.slane %v1558_v50, 2  ;;  %v1552_v41 = vrot.slane %v1551_v52, 1 }
 0x40b   : > { %v1027_v42 = vpack.c.bf16 %v1019_v8, %v1018_v56  ;;  %v1572_v58 = vsel %vm843_vm1, %v1018_v56, 0.0  ;;  %v1543_v46 = vrot.slane %v1542_v9, 1 }
 0x40c   : > { %v1574_v63 = vadd.f32 %v1573_v25, %v1572_v58  ;;  %v1567_v1 = vadd.f32 %v1566_v33, %v1565_v4  ;;  %v1560_v12 = vadd.f32 %v1559_v13, %v1558_v50  ;;  %v1553_v38 = vadd.f32 %v1552_v41, %v1551_v52 }
 0x40d   : > { %1450 = vxpose.xlu1.c.b16.start.end [1/1] (short) (narrow) %v1027_v42, 16  ;;  %v1544_v39 = vadd.f32 %v1543_v46, %v1542_v9 }
 0x40e   : > { %v1568_v40 = vrot.slane %v1567_v1, 2  ;;  %v1575_v11 = vrot.slane %v1574_v63, 4  ;;  %v1561_v53 = vrot.slane %v1560_v12, 1 }
 0x410   : > { %v1569_v30 = vadd.f32 %v1568_v40, %v1567_v1  ;;  %v1576_v61 = vadd.f32 %v1575_v11, %v1574_v63  ;;  %v1562_v27 = vadd.f32 %v1561_v53, %v1560_v12 }
 0x411   : > { %1585 = vbcast.lane.b32.xlu1 %v1526_v22, 256 }
 0x412   : > { %1582 = vbcast.lane.b32.xlu0 %v1517_v18, 256  ;;  %v1577_v14 = vrot.slane %v1576_v61, 2  ;;  %v1570_v15 = vrot.slane %v1569_v30, 1 }
 0x414   : > { %v1578_v19 = vadd.f32 %v1577_v14, %v1576_v61  ;;  %v1571_v5 = vadd.f32 %v1570_v15, %v1569_v30 }
 0x415   : > { %1588 = vbcast.lane.b32.xlu1 %v1535_v10, 256 }
 0x416   : > { %1594 = vbcast.lane.b32.xlu0 %v1553_v38, 256  ;;  %v1579_v23 = vrot.slane %v1578_v19, 1 }
 0x418   : > { %v1580_v45 = vadd.f32 %v1579_v23, %v1578_v19 }
 0x419   : > { %1591 = vbcast.lane.b32.xlu1 %v1544_v39, 256 }
 0x41a   : > { %1600 = vbcast.lane.b32.xlu0 %v1571_v5, 256 }
 0x41d   : > { %1597 = vbcast.lane.b32.xlu1 %v1562_v27, 256 }
 0x421   : > { %1603 = vbcast.lane.b32.xlu1 %v1580_v45, 256 }
 0x457   : > { %v1044_v21 = vpop.trf.xlu0 }
 0x458   : > { %3050 = vmatmul.mubr.msk.bf16.vlgmr.msra.gmra.mrb[16].mxu0 %vm1052_vm3, %v1044_v21 }
 0x459   : > { %3054 = vmatpush3.bf16.msra.mxu0 %v1029_v29  ;;  %3055 = vmatprep.mubr.msk.bf16.mxu0 %vm3530_vm2, %v3529_v51 }
 0x45a   : > { %3059 = vmatprep.subr.bf16.mxu0 %v3529_v51 }
 0x45b   : > { %v1104_v24 = vpop.trf.xlu1 }
 0x45f   : > { %v1163_v43 = vpop.trf.xlu0 }
 0x460   : > { %3056 = vmatmul.mubr.msk.bf16.vlgmr.msra.gmra.mrb[20].mxu0 %vm1052_vm3, %v1104_v24 }
 0x461   : > { %3060 = vmatpush3.bf16.msra.mxu0 %v1030_v37  ;;  %3061 = vmatprep.mubr.msk.bf16.mxu0 %vm3530_vm2, %v3529_v51 }
 0x462   : > { %3065 = vmatprep.subr.bf16.mxu0 %v3529_v51 }
 0x463   : > { %v1222_v26 = vpop.trf.xlu1 }
 0x467   : > { %v1281_v16 = vpop.trf.xlu0 }
 0x468   : > { %3062 = vmatmul.mubr.msk.bf16.vlgmr.msra.gmra.mrb[24].mxu0 %vm1052_vm3, %v1163_v43  ;;  %3074 = vmatmul.mubr.msk.bf16.vlgmr.msra.gmra.mrb[16].mxu1 %vm1052_vm3, %v1281_v16 }
 0x469   : > { %3066 = vmatpush3.bf16.msra.mxu0 %v1031_v49  ;;  %3084 = vmatpush3.bf16.msra.mxu1 %v1034_v28 }
 0x46a   : > { %3067 = vmatprep.mubr.msk.bf16.mxu0 %vm3530_vm2, %v3529_v51  ;;  %3077 = vmatprep.subr.bf16.mxu0 %v3529_v51 }
 0x46b   : > { %3085 = vmatprep.mubr.msk.bf16.mxu1 %vm3530_vm2, %v3529_v51  ;;  %v1340_v29 = vpop.trf.xlu1 }
 0x46f   : > { %v1399_v47 = vpop.trf.xlu0 }
 0x470   : > { %3068 = vmatmul.mubr.msk.bf16.vlgmr.msra.gmra.mrb[28].mxu0 %vm1052_vm3, %v1222_v26  ;;  %3086 = vmatmul.mubr.msk.bf16.vlgmr.msra.gmra.mrb[20].mxu1 %vm1052_vm3, %v1399_v47 }
 0x471   : > { %3078 = vmatpush3.bf16.msra.mxu0 %v1033_v6  ;;  %3079 = vmatprep.mubr.msk.bf16.mxu0 %vm3530_vm2, %v3529_v51 }
 0x472   : > { %3089 = vmatprep.subr.bf16.mxu0 %v3529_v51 }
 0x473   : > { %v1458_v35 = vpop.trf.xlu1 }
 0x478   : > { %3080 = vmatmul.mubr.msk.bf16.vlgmr.msra.gmra.mrb[32].mxu0 %vm1052_vm3, %v1340_v29 }
 0x479   : > { %3090 = vmatpush3.bf16.msra.mxu0 %v1035_v3  ;;  %3091 = vmatprep.mubr.msk.bf16.mxu0 %vm3530_vm2, %v3529_v51 }
 0x480   : > { %3092 = vmatmul.mubr.msk.bf16.vlgmr.msra.gmra.mrb[36].mxu0 %vm1052_vm3, %v1458_v35 }
 0x483   : > { %v1586_v0 = vpop.permute.xlu1 %1585 }
 0x484   : > { %v1583_v37 = vpop.permute.xlu0 %1582  ;;  %v1607_v17 = vmul.f32 %v4205_v55, %v1586_v0  ;;  %v3208_v0 = vld [vmem:[#allocation5 + $0x88] sm:$0xff]  }
 0x485   : > { %v1606_v54 = vmul.f32 %v4205_v55, %v1583_v37 }
 0x487   : > { %v1589_v8 = vpop.permute.xlu1 %1588 }
 0x488   : > { %v1595_v7 = vpop.permute.xlu0 %1594  ;;  %v1608_v36 = vmul.f32 %v4205_v55, %v1589_v8  ;;  %v3215_v8 = vld [vmem:[#allocation5 + $0x18] sm:$0xff]  }
 0x489   : > { %v1610_v31 = vmul.f32 %v4205_v55, %v1595_v7  ;;  %v3216_v7 = vld [vmem:[#allocation5 + $0x98] sm:$0xff]  }
 0x48b   : > { %v1592_v1 = vpop.permute.xlu1 %1591 }
 0x48c   : > { %v1601_v40 = vpop.permute.xlu0 %1600  ;;  %v1609_v11 = vmul.f32 %v4205_v55, %v1592_v1  ;;  %v3228_v1 = vld [vmem:[#allocation5 + $0xb0] sm:$0xff]  }
 0x48d   : > { %v1612_v13 = vmul.f32 %v4205_v55, %v1601_v40  ;;  %v3229_v40 = vld [vmem:[#allocation5 + $0x78] sm:$0xff]  }
 0x48f   : > { %v1598_v15 = vpop.permute.xlu1 %1597 }
 0x490   : > { %v1611_v39 = vmul.f32 %v4205_v55, %v1598_v15 }
 0x493   : > { %v1604_v24 = vpop.permute.xlu1 %1603 }
 0x494   : > { %v1613_v43 = vmul.f32 %v4205_v55, %v1604_v24  ;;  %v3206_v55 = vld [vmem:[#allocation5 + $0x48] sm:$0xff]  }
 0x52b   : > { %v1090_v49 = vpop.f32.mrb[16].mxu0 }
 0x52c   : > { %v4208_v62 = vsub.f32 %v1090_v49, %v1606_v54  ;;  %v3051_v59 = vpop.f32.mrb[17].mxu0  ;;  %v3201_v54 = vld [vmem:[#allocation5 + $0x40] sm:$0xff]  }
 0x52d   : > { %v1093_v60 = vpop.f32.mrb[18].mxu0  ;;  %v3202_v49 = vld [vmem:[#allocation5 + $0xc0] sm:$0xff]   ;;  %2871 = vmatprep.subr.bf16.mxu1 %v3201_v54 }
 0x52e   : > { %v3052_v6 = vpop.f32.mrb[19].mxu0  ;;  %v1622_v51 = vmul.f32 %v4208_v62, %v4208_v62  ;;  %v3203_v59 = vld [vmem:[#allocation5] sm:$0xff]   ;;  %2893 = vmatprep.subr.bf16.mxu0 %v3202_v49 }
 0x52f   : > { %v3204_v60 = vld [vmem:[#allocation5 + $0x80] sm:$0xff]   ;;  %2872 = vmatpush3.bf16.msra.mxu1 %v3203_v59  ;;  %v3205_v6 = vld [vmem:[#allocation5 + $0xc8] sm:$0xff]  }
 0x530   : > { %1630 = vadd.xlane.f32.xlu0 %v1622_v51  ;;  %2894 = vmatpush3.bf16.msra.mxu0 %v3204_v60  ;;  %v3207_v51 = vld [vmem:[#allocation5 + $0x8] sm:$0xff]  }
 0x531   : > { %2895 = vmatprep.subr.bf16.mxu0 %v3205_v6  ;;  %2873 = vmatprep.subr.bf16.mxu1 %v3206_v55 }
 0x533   : > { %v1149_v28 = vpop.f32.mrb[20].mxu0  ;;  %2874 = vmatpush3.bf16.msra.mxu1 %v3207_v51 }
 0x534   : > { %v4213_v2 = vsub.f32 %v1149_v28, %v1607_v17  ;;  %v3057_v3 = vpop.f32.mrb[21].mxu0  ;;  %2896 = vmatpush3.bf16.msra.mxu0 %v3208_v0  ;;  %v3209_v17 = vld [vmem:[#allocation5 + $0x50] sm:$0xff]  }
 0x535   : > { %v1152_v48 = vpop.f32.mrb[22].mxu0  ;;  %v3210_v28 = vld [vmem:[#allocation5 + $0xd0] sm:$0xff]   ;;  %2875 = vmatprep.subr.bf16.mxu1 %v3209_v17 }
 0x536   : > { %v3058_v32 = vpop.f32.mrb[23].mxu0  ;;  %v1623_v4 = vmul.f32 %v4213_v2, %v4213_v2  ;;  %v3211_v3 = vld [vmem:[#allocation5 + $0x10] sm:$0xff]   ;;  %2897 = vmatprep.subr.bf16.mxu0 %v3210_v28 }
 0x537   : > { %v3212_v48 = vld [vmem:[#allocation5 + $0x90] sm:$0xff]   ;;  %2876 = vmatpush3.bf16.msra.mxu1 %v3211_v3  ;;  %v3213_v32 = vld [vmem:[#allocation5 + $0x58] sm:$0xff]  }
 0x538   : > { %1632 = vadd.xlane.f32.xlu1 %v1623_v4  ;;  %2898 = vmatpush3.bf16.msra.mxu0 %v3212_v48  ;;  %v3214_v4 = vld [vmem:[#allocation5 + $0xd8] sm:$0xff]  }
 0x539   : > { %2877 = vmatprep.subr.bf16.mxu1 %v3213_v32  ;;  %2899 = vmatprep.subr.bf16.mxu0 %v3214_v4 }
 0x53b   : > { %v1208_v56 = vpop.f32.mrb[24].mxu0  ;;  %v1326_v25 = vpop.f32.mrb[16].mxu1  ;;  %2878 = vmatpush3.bf16.msra.mxu1 %v3215_v8 }
 0x53c   : > { %v4219_v34 = vsub.f32 %v1208_v56, %v1608_v36  ;;  %v3063_v33 = vpop.f32.mrb[25].mxu0  ;;  %v3075_v42 = vpop.f32.mrb[17].mxu1  ;;  %v4221_v50 = vsub.f32 %v1326_v25, %v1610_v31  ;;  %2900 = vmatpush3.bf16.msra.mxu0 %v3216_v7  ;;  %v3217_v36 = vld [vmem:[#allocation5 + $0x60] sm:$0xff]   ;;  %v3531_v7 = vmov 1983009808  }
 0x53d   : > { %v1211_v58 = vpop.f32.mrb[26].mxu0  ;;  %v1329_v44 = vpop.f32.mrb[18].mxu1  ;;  %v3218_v56 = vld [vmem:[#allocation5 + $0xe0] sm:$0xff]   ;;  %2879 = vmatprep.subr.bf16.mxu1 %v3217_v36  ;;  %v3221_v33 = vld [vmem:[#allocation5 + $0x68] sm:$0xff]   ;;  %v1737_v36 = vunpack.c.l.s4 %v3531_v7 }
 0x53e   : > { %v3064_v63 = vpop.f32.mrb[27].mxu0  ;;  %v1624_v20 = vmul.f32 %v4219_v34, %v4219_v34  ;;  %v3076_v52 = vpop.f32.mrb[19].mxu1  ;;  %v1626_v22 = vmul.f32 %v4221_v50, %v4221_v50  ;;  %v3219_v25 = vld [vmem:[#allocation5 + $0x20] sm:$0xff]   ;;  %2901 = vmatprep.subr.bf16.mxu0 %v3218_v56  ;;  %v3222_v42 = vld [vmem:[#allocation5 + $0xe8] sm:$0xff]  }
 0x53f   : > { %v3220_v31 = vld [vmem:[#allocation5 + $0xa0] sm:$0xff]   ;;  %2880 = vmatpush3.bf16.msra.mxu1 %v3219_v25  ;;  %v3223_v58 = vld [vmem:[#allocation5 + $0x28] sm:$0xff]   ;;  %v3225_v63 = vld [vmem:[#allocation5 + $0x70] sm:$0xff]   ;;  %v1739_v25 = vlaneseq }
 0x540   : > { %1634 = vadd.xlane.f32.xlu0 %v1624_v20  ;;  %2902 = vmatpush3.bf16.msra.mxu0 %v3220_v31  ;;  %v3224_v44 = vld [vmem:[#allocation5 + $0xa8] sm:$0xff]   ;;  %v3226_v20 = vld [vmem:[#allocation5 + $0xf0] sm:$0xff]  }
 0x541   : > { %2881 = vmatprep.subr.bf16.mxu1 %v3221_v33  ;;  %2903 = vmatprep.subr.bf16.mxu0 %v3222_v42  ;;  %v3227_v52 = vld [vmem:[#allocation5 + $0x30] sm:$0xff]  }
 0x543   : > { %v1267_v57 = vpop.f32.mrb[28].mxu0  ;;  %v1444_v9 = vpop.f32.mrb[20].mxu1  ;;  %2882 = vmatpush3.bf16.msra.mxu1 %v3223_v58 }
 0x544   : > { %v4229_v18 = vsub.f32 %v1267_v57, %v1609_v11  ;;  %v3069_v41 = vpop.f32.mrb[29].mxu0  ;;  %1638 = vadd.xlane.f32.xlu0 %v1626_v22  ;;  %v3087_v30 = vpop.f32.mrb[21].mxu1  ;;  %v4231_v46 = vsub.f32 %v1444_v9, %v1612_v13  ;;  %2904 = vmatpush3.bf16.msra.mxu0 %v3224_v44  ;;  %v3230_v11 = vld [vmem:[#allocation5 + $0xf8] sm:$0xff]   ;;  %v3233_v9 = vld [vmem:[#allocation5 + $0x140] sm:$0xff]  }
 0x545   : > { %v1270_v61 = vpop.f32.mrb[30].mxu0  ;;  %v1447_v10 = vpop.f32.mrb[22].mxu1  ;;  %2883 = vmatprep.subr.bf16.mxu1 %v3225_v63  ;;  %2905 = vmatprep.subr.bf16.mxu0 %v3226_v20  ;;  %v3231_v22 = vld [vmem:[#allocation5 + $0x38] sm:$0xff]   ;;  %v3234_v13 = vld [vmem:[#allocation5 + $0x1c0] sm:$0xff]  }
 0x546   : > { %v3070_v12 = vpop.f32.mrb[31].mxu0  ;;  %v1625_v14 = vmul.f32 %v4229_v18, %v4229_v18  ;;  %v3088_v38 = vpop.f32.mrb[23].mxu1  ;;  %v1628_v53 = vmul.f32 %v4231_v46, %v4231_v46  ;;  %v3232_v57 = vld [vmem:[#allocation5 + $0xb8] sm:$0xff]  }
 0x547   : > { %2884 = vmatpush3.bf16.msra.mxu1 %v3227_v52  ;;  %v1738_v52 = vunpack.c.0.s8 %v1737_v36 }
 0x548   : > { %1636 = vadd.xlane.f32.xlu0 %v1625_v14  ;;  %2906 = vmatpush3.bf16.msra.mxu0 %v3228_v1 }
 0x549   : > { %2885 = vmatprep.subr.bf16.mxu1 %v3229_v40  ;;  %2907 = vmatprep.subr.bf16.mxu0 %v3230_v11  ;;  %v1740_v11 = vshrl.u32 %v1739_v25, 7 }
 0x54b   : > { %v1385_v19 = vpop.f32.mrb[32].mxu0  ;;  %2886 = vmatpush3.bf16.msra.mxu1 %v3231_v22 }
 0x54c   : > { %v4238_v5 = vsub.f32 %v1385_v19, %v1611_v39  ;;  %v3081_v27 = vpop.f32.mrb[33].mxu0  ;;  %1642 = vadd.xlane.f32.xlu0 %v1628_v53  ;;  %2908 = vmatpush3.bf16.msra.mxu0 %v3232_v57 }
 0x54d   : > { %v1388_v23 = vpop.f32.mrb[34].mxu0  ;;  %2915 = vmatprep.subr.bf16.mxu1 %v3233_v9  ;;  %2937 = vmatprep.subr.bf16.mxu0 %v3234_v13  ;;  %v3532_v13 = vmov 1934713408  }
 0x54e   : > { %v3082_v45 = vpop.f32.mrb[35].mxu0  ;;  %v1627_v21 = vmul.f32 %v4238_v5, %v4238_v5 }
 0x550   : > { %1640 = vadd.xlane.f32.xlu1 %v1627_v21 }
 0x553   : > { %v1503_v16 = vpop.f32.mrb[36].mxu0 }
 0x554   : > { %v4243_v26 = vsub.f32 %v1503_v16, %v1613_v43  ;;  %v3093_v47 = vpop.f32.mrb[37].mxu0 }
 0x555   : > { %v1506_v29 = vpop.f32.mrb[38].mxu0 }
 0x556   : > { %v3094_v35 = vpop.f32.mrb[39].mxu0  ;;  %v1629_v37 = vmul.f32 %v4243_v26, %v4243_v26 }
 0x558   : > { %1644 = vadd.xlane.f32.xlu1 %v1629_v37 }
 0x5bd   : > { %v1631_v41 = vpop.xlane.xlu0 %1630 }
 0x5be   : > { %v1646_v30 = vmax.f32 %v1631_v41, 1e-24 }
 0x5c0   : > { %3361 = vrsqrt.f32 %v1646_v30 }
 0x5c5   : > { %v1633_v61 = vpop.xlane.xlu1 %1632 }
 0x5c6   : > { %v1647_v10 = vmax.f32 %v1633_v61, 1e-24 }
 0x5c8   : > { %3363 = vrsqrt.f32 %v1647_v10 }
 0x5ca   : > { %v4247_v12 = vpop.eup %3361 }
 0x5cb   : > { %v1670_v14 = vmul.f32 %v4247_v12, %v4247_v12 }
 0x5cd   : > { %v1678_v38 = vmul.f32 %v1670_v14, %v1631_v41  ;;  %v1635_v15 = vpop.xlane.xlu0 %1634  ;;  %v1801_v41 = vunpack.c.l.s4 %v3532_v13 }
 0x5ce   : > { %v1648_v39 = vmax.f32 %v1635_v15, 1e-24 }
 0x5cf   : > { %v1686_v53 = vrot.slane %v1678_v38, 4 }
 0x5d0   : > { %3365 = vrsqrt.f32 %v1648_v39 }
 0x5d1   : > { %v1687_v19 = vadd.f32 %v1686_v53, %v1678_v38  ;;  %v1639_v27 = vpop.xlane.xlu0 %1638  ;;  %v1662_v53 = vmul.f32 %v4247_v12, %v4208_v62 }
 0x5d2   : > { %v3364_v23 = vpop.eup %3363  ;;  %v1650_v45 = vmax.f32 %v1639_v27, 1e-24 }
 0x5d3   : > { %v1688_v21 = vrot.slane %v1687_v19, 2  ;;  %v1671_v24 = vmul.f32 %v3364_v23, %v3364_v23 }
 0x5d4   : > { %3367 = vrsqrt.f32 %v1650_v45 }
 0x5d5   : > { %v1689_v43 = vadd.f32 %v1688_v21, %v1687_v19  ;;  %v1679_v16 = vmul.f32 %v1671_v24, %v1633_v61  ;;  %v1637_v47 = vpop.xlane.xlu0 %1636  ;;  %v1663_v61 = vmul.f32 %v3364_v23, %v4213_v2 }
 0x5d6   : > { %v1649_v29 = vmax.f32 %v1637_v47, 1e-24 }
 0x5d7   : > { %v1692_v35 = vrot.slane %v1679_v16, 4  ;;  %v1690_v37 = vrot.slane %v1689_v43, 1 }
 0x5d8   : > { %3369 = vrsqrt.f32 %v1649_v29 }
 0x5d9   : > { %v1693_v54 = vadd.f32 %v1692_v35, %v1679_v16  ;;  %v1643_v49 = vpop.xlane.xlu0 %1642  ;;  %v1691_v51 = vadd.f32 %v1690_v37, %v1689_v43  ;;  %v4262_v43 = vsub.s32 %v1738_v52, %v1740_v11  ;;  %v1802_v16 = vunpack.c.0.s8 %v1801_v41 }
 0x5da   : > { %v3366_v59 = vpop.eup %3365  ;;  %v1652_v60 = vmax.f32 %v1643_v49, 1e-24 }
 0x5db   : > { %v1694_v6 = vrot.slane %v1693_v54, 2  ;;  %v1672_v55 = vmul.f32 %v3366_v59, %v3366_v59  ;;  %v2550_v56 = vmax.f32 %v1691_v51, 1e-24  ;;  %v1664_v10 = vmul.f32 %v3366_v59, %v4219_v34 }
 0x5dc   : > { %3371 = vrsqrt.f32 %v1652_v60 }
 0x5dd   : > { %v1695_v0 = vadd.f32 %v1694_v6, %v1693_v54  ;;  %v1680_v17 = vmul.f32 %v1672_v55, %v1635_v15  ;;  %v4251_v28 = vpop.xlane.xlu1 %1640  ;;  %v1734_v34 = vcombine.low %v1662_v53, %v1664_v10  ;;  %v1735_v59 = vcombine.high %v1662_v53, %v1664_v10 }
 0x5de   : > { %v3368_v3 = vpop.eup %3367  ;;  %v1651_v48 = vmax.f32 %v4251_v28, 1e-24 }
 0x5df   : > { %v1696_v32 = vrot.slane %v1695_v0, 1  ;;  %v1698_v4 = vrot.slane %v1680_v17, 4  ;;  %v1674_v8 = vmul.f32 %v3368_v3, %v3368_v3 }
 0x5e0   : > { %3373 = vrsqrt.f32 %v1651_v48  ;;  %v1805_v48 = vsub.s32 %v1802_v16, %v1740_v11 }
 0x5e1   : > { %v1697_v31 = vadd.f32 %v1696_v32, %v1695_v0  ;;  %v1699_v33 = vadd.f32 %v1698_v4, %v1680_v17  ;;  %v1682_v42 = vmul.f32 %v1674_v8, %v1639_v27  ;;  %3375 = vrsqrt.f32 %v2550_v56 }
 0x5e2   : > { %v3370_v58 = vpop.eup %3369  ;;  %v1742_v17 = vrot.slane %v1734_v34, %v4262_v43 }
 0x5e3   : > { %v2551_v44 = vmax.f32 %v1697_v31, 1e-24  ;;  %v1700_v63 = vrot.slane %v1699_v33, 2  ;;  %v1710_v20 = vrot.slane %v1682_v42, 4  ;;  %v1665_v1 = vmul.f32 %v3370_v58, %v4229_v18 }
 0x5e4   : > { %v1673_v40 = vmul.f32 %v3370_v58, %v3370_v58  ;;  %v1749_v31 = vrot.slane %v1735_v59, %v4262_v43 }
 0x5e5   : > { %3377 = vrsqrt.f32 %v2551_v44  ;;  %v1701_v22 = vadd.f32 %v1700_v63, %v1699_v33  ;;  %v1711_v57 = vadd.f32 %v1710_v20, %v1682_v42  ;;  %v4255_v9 = vpop.xlane.xlu1 %1644  ;;  %v1750_v27 = vcombine.low %v1663_v61, %v1665_v1 }
 0x5e6   : > { %v3372_v30 = vpop.eup %3371  ;;  %v1681_v14 = vmul.f32 %v1673_v40, %v1637_v47  ;;  %v1653_v38 = vmax.f32 %v4255_v9, 1e-24  ;;  %v1751_v6 = vcombine.high %v1663_v61, %v1665_v1 }
 0x5e7   : > { %v1702_v15 = vrot.slane %v1701_v22, 1  ;;  %v1712_v39 = vrot.slane %v1711_v57, 2  ;;  %v1676_v18 = vmul.f32 %v3372_v30, %v3372_v30  ;;  %v1668_v35 = vmul.f32 %v3372_v30, %v4231_v46 }
 0x5e8   : > { %v1704_v19 = vrot.slane %v1681_v14, 4  ;;  %3379 = vrsqrt.f32 %v1653_v38  ;;  %v1758_v12 = vrot.slane %v1750_v27, %v4262_v43  ;;  %v1765_v33 = vrot.slane %v1751_v6, %v4262_v43 }
 0x5e9   : > { %v1703_v45 = vadd.f32 %v1702_v15, %v1701_v22  ;;  %v1713_v21 = vadd.f32 %v1712_v39, %v1711_v57  ;;  %v1684_v24 = vmul.f32 %v1676_v18, %v1643_v49  ;;  %v1666_v49 = vmul.f32 %v3368_v3, %v4221_v50 }
 0x5ea   : > { %v3374_v2 = vpop.eup %3373  ;;  %v1705_v23 = vadd.f32 %v1704_v19, %v1681_v14  ;;  %v1798_v56 = vcombine.low %v1742_v17, %v1758_v12  ;;  %v1799_v3 = vcombine.high %v1742_v17, %v1758_v12  ;;  %v1815_v38 = vcombine.high %v1749_v31, %v1765_v33 }
 0x5eb   : > { %v2552_v47 = vmax.f32 %v1703_v45, 1e-24  ;;  %v1714_v29 = vrot.slane %v1713_v21, 1  ;;  %v1722_v37 = vrot.slane %v1684_v24, 4  ;;  %v1675_v62 = vmul.f32 %v3374_v2, %v3374_v2  ;;  %v3376_v55 = vpop.eup %3375 }
 0x5ec   : > { %v1706_v54 = vrot.slane %v1705_v23, 2  ;;  %v1766_v8 = vcombine.low %v1666_v49, %v1668_v35  ;;  %v1667_v58 = vmul.f32 %v3374_v2, %v4238_v5  ;;  %v1767_v63 = vcombine.high %v1666_v49, %v1668_v35 }
 0x5ed   : > { %3381 = vrsqrt.f32 %v2552_v47  ;;  %v1723_v60 = vadd.f32 %v1722_v37, %v1684_v24  ;;  %v1683_v0 = vmul.f32 %v1675_v62, %v4251_v28  ;;  %v1715_v46 = vadd.f32 %v1714_v29, %v1713_v21 }
 0x5ee   : > { %v1707_v51 = vadd.f32 %v1706_v54, %v1705_v23  ;;  %v1774_v57 = vrot.slane %v1766_v8, %v4262_v43  ;;  %v1806_v13 = vrot.slane %v1798_v56, %v1805_v48  ;;  %v1814_v5 = vcombine.low %v1749_v31, %v1765_v33  ;;  %v3235_v8 = vld [vmem:[#allocation5 + $0x100] sm:$0xff]  }
 0x5ef   : > { %v3378_v32 = vpop.eup %3377  ;;  %v1724_v4 = vrot.slane %v1723_v60, 2  ;;  %v1716_v36 = vrot.slane %v1683_v0, 4  ;;  %v2554_v20 = vmax.f32 %v1715_v46, 1e-24  ;;  %v1781_v27 = vrot.slane %v1767_v63, %v4262_v43  ;;  %v3240_v63 = vld [vmem:[#allocation5 + $0x188] sm:$0xff]  }
 0x5f0   : > { %v1708_v7 = vrot.slane %v1707_v51, 1  ;;  %v2575_v25 = vsel %vm2574_vm4, %v3378_v32, %v3376_v55  ;;  %v1813_v24 = vrot.slane %v1799_v3, %v1805_v48  ;;  %v4280_v34 = vrot.slane %v1814_v5, %v1805_v48  ;;  %v3238_v3 = vld [vmem:[#allocation5 + $0x1c8] sm:$0xff]   ;;  %v3250_v5 = vld [vmem:[#allocation5 + $0x1e0] sm:$0xff]  }
 0x5f1   : > { %v1725_v50 = vadd.f32 %v1724_v4, %v1723_v60  ;;  %v1717_v44 = vadd.f32 %v1716_v36, %v1683_v0  ;;  %v4282_v54 = vrot.slane %v1815_v38, %v1805_v48 }
 0x5f2   : > { %v3380_v28 = vpop.eup %3379  ;;  %v1709_v42 = vadd.f32 %v1708_v7, %v1707_v51  ;;  %v3236_v7 = vld [vmem:[#allocation5 + $0x180] sm:$0xff]  }
 0x5f3   : > { %v1726_v52 = vrot.slane %v1725_v50, 1  ;;  %v1669_v1 = vmul.f32 %v3380_v28, %v4243_v26  ;;  %v1677_v40 = vmul.f32 %v3380_v28, %v3380_v28  ;;  %v1718_v22 = vrot.slane %v1717_v44, 2 }
 0x5f4   : > { %v2553_v11 = vmax.f32 %v1709_v42, 1e-24 }
 0x5f5   : > { %v1727_v41 = vadd.f32 %v1726_v52, %v1725_v50  ;;  %v1685_v30 = vmul.f32 %v1677_v40, %v4255_v9  ;;  %v1782_v61 = vcombine.low %v1667_v58, %v1669_v1  ;;  %v1783_v10 = vcombine.high %v1667_v58, %v1669_v1  ;;  %v3237_v50 = vld [vmem:[#allocation5 + $0x148] sm:$0xff]   ;;  %v3242_v52 = vld [vmem:[#allocation5 + $0x1d0] sm:$0xff]  }
 0x5f6   : > { %3383 = vrsqrt.f32 %v2553_v11  ;;  %v1719_v14 = vadd.f32 %v1718_v22, %v1717_v44  ;;  %v3239_v44 = vld [vmem:[#allocation5 + $0x108] sm:$0xff]   ;;  %v3243_v40 = vld [vmem:[#allocation5 + $0x110] sm:$0xff]  }
 0x5f7   : > { %v3382_v15 = vpop.eup %3381  ;;  %3385 = vrsqrt.f32 %v2554_v20  ;;  %v1728_v39 = vrot.slane %v1685_v30, 4  ;;  %v1790_v26 = vrot.slane %v1782_v61, %v4262_v43  ;;  %v1797_v18 = vrot.slane %v1783_v10, %v4262_v43  ;;  %v3241_v20 = vld [vmem:[#allocation5 + $0x150] sm:$0xff]   ;;  %v3247_v61 = vld [vmem:[#allocation5 + $0x118] sm:$0xff]  }
 0x5f8   : > { %v2556_v53 = vmax.f32 %v1727_v41, 1e-24  ;;  %v1720_v19 = vrot.slane %v1719_v14, 1  ;;  %v2577_v9 = vsel %vm2576_vm5, %v3382_v15, %v2575_v25  ;;  %v3244_v11 = vld [vmem:[#allocation5 + $0x190] sm:$0xff]   ;;  %v3248_v10 = vld [vmem:[#allocation5 + $0x198] sm:$0xff]   ;;  %v3251_v15 = vld [vmem:[#allocation5 + $0x120] sm:$0xff]  }
 0x5f9   : > { %v1729_v45 = vadd.f32 %v1728_v39, %v1685_v30  ;;  %v1830_v21 = vcombine.low %v1774_v57, %v1790_v26  ;;  %v1831_v2 = vcombine.high %v1774_v57, %v1790_v26  ;;  %v1846_v16 = vcombine.low %v1781_v27, %v1797_v18  ;;  %v3245_v57 = vld [vmem:[#allocation5 + $0x158] sm:$0xff]   ;;  %v3252_v39 = vld [vmem:[#allocation5 + $0x1a0] sm:$0xff]   ;;  %v3253_v26 = vld [vmem:[#allocation5 + $0x168] sm:$0xff]  }
 0x5fa   : > { %v1721_v23 = vadd.f32 %v1720_v19, %v1719_v14  ;;  %v1847_v47 = vcombine.high %v1781_v27, %v1797_v18  ;;  %3387 = vrsqrt.f32 %v2556_v53  ;;  %v3249_v14 = vld [vmem:[#allocation5 + $0x160] sm:$0xff]   ;;  %v3254_v18 = vld [vmem:[#allocation5 + $0x1e8] sm:$0xff]  }
 0x5fb   : > { %v1730_v29 = vrot.slane %v1729_v45, 2  ;;  %v1838_v35 = vrot.slane %v1830_v21, %v1805_v48  ;;  %v1845_v37 = vrot.slane %v1831_v2, %v1805_v48  ;;  %v4284_v12 = vrot.slane %v1846_v16, %v1805_v48  ;;  %v3255_v19 = vld [vmem:[#allocation5 + $0x128] sm:$0xff]   ;;  %v3259_v21 = vld [vmem:[#allocation5 + $0x130] sm:$0xff]   ;;  %v3261_v2 = vld [vmem:[#allocation5 + $0x178] sm:$0xff]  }
 0x5fc   : > { %v2555_v62 = vmax.f32 %v1721_v23, 1e-24  ;;  %v4286_v43 = vrot.slane %v1847_v47, %v1805_v48  ;;  %v3256_v27 = vld [vmem:[#allocation5 + $0x1a8] sm:$0xff]   ;;  %v3262_v23 = vld [vmem:[#allocation5 + $0x1f8] sm:$0xff]  }
 0x5fd   : > { %v1731_v59 = vadd.f32 %v1730_v29, %v1729_v45  ;;  %v1863_v49 = vcombine.high %v1806_v13, %v1838_v35  ;;  %v1865_v60 = vcombine.high %v1813_v24, %v1845_v37  ;;  %v1862_v6 = vcombine.low %v1806_v13, %v1838_v35  ;;  %v3246_v13 = vld [vmem:[#allocation5 + $0x1d8] sm:$0xff]   ;;  %v3258_v45 = vld [vmem:[#allocation5 + $0x1f0] sm:$0xff]  }
 0x5fe   : > { %3389 = vrsqrt.f32 %v2555_v62  ;;  %v1864_v55 = vcombine.low %v1813_v24, %v1845_v37  ;;  %v1867_v51 = vcombine.high %v4280_v34, %v4284_v12  ;;  %v1869_v0 = vcombine.high %v4282_v54, %v4286_v43  ;;  %v3260_v24 = vld [vmem:[#allocation5 + $0x1b0] sm:$0xff]   ;;  %v3263_v16 = vld [vmem:[#allocation5 + $0x138] sm:$0xff]  }
 0x5ff   : > { %v1732_v17 = vrot.slane %v1731_v59, 1  ;;  %v1871_v32 = vpack.c.bf16 %v1863_v49, %v1863_v49  ;;  %v1873_v46 = vpack.c.bf16 %v1865_v60, %v1865_v60  ;;  %v1870_v4 = vpack.c.bf16 %v1862_v6, %v1862_v6  ;;  %v3264_v47 = vld [vmem:[#allocation5 + $0x1b8] sm:$0xff]  }
 0x600   : > { %v3384_v48 = vpop.eup %3383  ;;  %v1872_v36 = vpack.c.bf16 %v1864_v55, %v1864_v55  ;;  %v1875_v33 = vpack.c.bf16 %v1867_v51, %v1867_v51  ;;  %v1877_v28 = vpack.c.bf16 %v1869_v0, %v1869_v0  ;;  %v1866_v29 = vcombine.low %v4280_v34, %v4284_v12 }
 0x601   : > { %v3386_v56 = vpop.eup %3385  ;;  %v1733_v25 = vadd.f32 %v1732_v17, %v1731_v59  ;;  %2422 = vmatprep.mubr.bf16.mxu1 %v1871_v32  ;;  %2462 = vmatprep.mubr.bf16.mxu0 %v1873_v46  ;;  %v2579_v31 = vsel %vm2578_vm6, %v3384_v48, %v2577_v9  ;;  %v3257_v9 = vld [vmem:[#allocation5 + $0x170] sm:$0xff]   ;;  %v1868_v35 = vcombine.low %v4282_v54, %v4286_v43 }
 0x602   : > { %2423 = vmatmul.mubr.bf16.vlgmr.msra.gmra.mrb[24].mxu1 %v1870_v4  ;;  %2463 = vmatmul.mubr.bf16.vlgmr.msra.gmra.mrb[40].mxu0 %v1872_v36  ;;  %v2581_v42 = vsel %vm2580_vm7, %v3386_v56, %v2579_v31  ;;  %v1874_v37 = vpack.c.bf16 %v1866_v29, %v1866_v29  ;;  %v2796_v31 = vld [vmem:[%s4357_s7] ss:$0 sm:$0xff] }
 0x603   : > { %v2557_v58 = vmax.f32 %v1733_v25, 1e-24  ;;  %2916 = vmatpush3.bf16.msra.mxu1 %v3235_v8  ;;  %2938 = vmatpush3.bf16.msra.mxu0 %v3236_v7  ;;  %v1876_v62 = vpack.c.bf16 %v1868_v35, %v1868_v35 }
 0x604   : > { %2502 = vmatprep.mubr.bf16.mxu1 %v1875_v33  ;;  %2542 = vmatprep.mubr.bf16.mxu0 %v1877_v28  ;;  %v3388_v1 = vpop.eup %3387 }
 0x605   : > { %3391 = vrsqrt.f32 %v2557_v58  ;;  %2917 = vmatprep.subr.bf16.mxu1 %v3237_v50  ;;  %2939 = vmatprep.subr.bf16.mxu0 %v3238_v3 }
 0x607   : > { %2918 = vmatpush3.bf16.msra.mxu1 %v3239_v44  ;;  %2940 = vmatpush3.bf16.msra.mxu0 %v3240_v63 }
 0x608   : > { %v3390_v22 = vpop.eup %3389  ;;  %2919 = vmatprep.subr.bf16.mxu1 %v3241_v20  ;;  %2941 = vmatprep.subr.bf16.mxu0 %v3242_v52 }
 0x609   : > { %v2583_v41 = vsel %vm2582_vm8, %v3390_v22, %v2581_v42 }
 0x60a   : > { %v2585_v30 = vsel %vm2584_vm9, %v3388_v1, %v2583_v41 }
 0x60b   : > { %2920 = vmatpush3.bf16.msra.mxu1 %v3243_v40  ;;  %2942 = vmatpush3.bf16.msra.mxu0 %v3244_v11 }
 0x60c   : > { %2921 = vmatprep.subr.bf16.mxu1 %v3245_v57  ;;  %2943 = vmatprep.subr.bf16.mxu0 %v3246_v13 }
 0x60f   : > { %v3392_v38 = vpop.eup %3391  ;;  %2922 = vmatpush3.bf16.msra.mxu1 %v3247_v61  ;;  %2944 = vmatpush3.bf16.msra.mxu0 %v3248_v10 }
 0x610   : > { %2923 = vmatprep.subr.bf16.mxu1 %v3249_v14  ;;  %2945 = vmatprep.subr.bf16.mxu0 %v3250_v5  ;;  %v2587_v53 = vsel %vm2586_vm10, %v3392_v38, %v2585_v30 }
 0x613   : > { %2924 = vmatpush3.bf16.msra.mxu1 %v3251_v15  ;;  %2946 = vmatpush3.bf16.msra.mxu0 %v3252_v39 }
 0x614   : > { %2925 = vmatprep.subr.bf16.mxu1 %v3253_v26  ;;  %2947 = vmatprep.subr.bf16.mxu0 %v3254_v18 }
 0x617   : > { %2926 = vmatpush3.bf16.msra.mxu1 %v3255_v19  ;;  %2948 = vmatpush3.bf16.msra.mxu0 %v3256_v27 }
 0x618   : > { %2927 = vmatprep.subr.bf16.mxu1 %v3257_v9  ;;  %2949 = vmatprep.subr.bf16.mxu0 %v3258_v45 }
 0x61b   : > { %2928 = vmatpush3.bf16.msra.mxu1 %v3259_v21  ;;  %2950 = vmatpush3.bf16.msra.mxu0 %v3260_v24 }
 0x61c   : > { %2929 = vmatprep.subr.bf16.mxu1 %v3261_v2  ;;  %2951 = vmatprep.subr.bf16.mxu0 %v3262_v23 }
 0x61f   : > { %2930 = vmatpush3.bf16.msra.mxu1 %v3263_v16  ;;  %2952 = vmatpush3.bf16.msra.mxu0 %v3264_v47 }
 0x622   : > { %2503 = vmatmul.mubr.bf16.vlgmr.msra.gmra.mrb[28].mxu1 %v1874_v37  ;;  %2543 = vmatmul.mubr.bf16.vlgmr.msra.gmra.mrb[44].mxu0 %v1876_v62 }
 0x6d5   : > { %v2887_v59 = vpop.f32.mrb[24].mxu1  ;;  %v2909_v49 = vpop.f32.mrb[40].mxu0 }
 0x6d6   : > { %v2888_v60 = vpop.f32.mrb[25].mxu1  ;;  %v2910_v6 = vpop.f32.mrb[41].mxu0 }
 0x6d7   : > { %v2889_v55 = vadd.f32 %v2888_v60, %v2887_v59  ;;  %v2911_v51 = vadd.f32 %v2910_v6, %v2909_v49  ;;  %v2890_v0 = vpop.f32.mrb[26].mxu1  ;;  %v2912_v17 = vpop.f32.mrb[42].mxu0 }
 0x6d8   : > { %v2891_v32 = vpop.f32.mrb[27].mxu1  ;;  %v2913_v34 = vpop.f32.mrb[43].mxu0 }
 0x6d9   : > { %v2465_v12 = vadd.f32 %v2911_v51, %v2889_v55 }
 0x6f5   : > { %v2931_v54 = vpop.f32.mrb[28].mxu1  ;;  %v2953_v43 = vpop.f32.mrb[44].mxu0 }
 0x6f6   : > { %v2932_v46 = vpop.f32.mrb[29].mxu1  ;;  %v2954_v4 = vpop.f32.mrb[45].mxu0 }
 0x6f7   : > { %v2933_v8 = vadd.f32 %v2932_v46, %v2931_v54  ;;  %v2955_v7 = vadd.f32 %v2954_v4, %v2953_v43  ;;  %v2934_v48 = vpop.f32.mrb[30].mxu1  ;;  %v2956_v36 = vpop.f32.mrb[46].mxu0 }
 0x6f8   : > { %v2935_v56 = vpop.f32.mrb[31].mxu1  ;;  %v2957_v25 = vpop.f32.mrb[47].mxu0 }
 0x6f9   : > { %v2505_v50 = vadd.f32 %v2933_v8, %v2465_v12 }
 0x6fb   : > { %v2545_v3 = vadd.f32 %v2955_v7, %v2505_v50 }
 0x6fd   : > { %v2589_v33 = vmul.f32 %v2587_v53, %v2545_v3 }
 0x6ff   : > { %v2597_v28 = vadd.f32 %v2796_v31, %v2589_v33 }
 0x701   : > { %v2598_v42 = vmax.f32 %v2597_v28, 0.0 }
 0x703   : > { %2599 = vst [vmem:[%s339_s25] sm:$0xff] %v2598_v42 }
 0x704   : > { %3464 = shalt.err (!%p3461_p7)
}
 0x705   : > { %s3465_s10 = scalar_lea.hbm %s4306_s18, 128  ;;  %s3469_s26 = scalar_lea.hbm %s4358_s8, 256 }
 0x706   : > { %p3466_p9 = scmp.ne.s32.totalorder %s4306_s18, %s3465_s10  ;;  %p3470_p5 = scmp.lt.u32.totalorder %s4306_s18, %s4358_s8 }
 0x707   : > { %p3471_p11 = scmp.lt.u32.totalorder %s3469_s26, %s3465_s10  ;;  %p3473_p4 = scmp.lt.u32.totalorder %s3465_s10, %s4306_s18 }
 0x708   : > { %p3467_p2 = pnand %p3466_p9, %p3670_p12 }
 0x709   : > { %p3472_p1 = por %p3471_p11, %p3470_p5 }
 0x70a   : > { %p3468_p0 = pneg %p3467_p2 }
 0x70b   : > { %p3474_p6 = por %p3473_p4, %p3472_p1 }
 0x70d   : > { %p3475_p8 = pnand %p3474_p6, %p3468_p0 }
 0x70f   : > { %3478 = shalt.err (!%p3475_p8)
}
 0x710   : > { %3141 = dma.vmem_to_hbm [thread:$0]  (%p3670_p12), %s4308_s13, 128, %s4306_s18, %s2601_s19  }
 0x711 PF: > { %s2626_s21 = sand.u32 1, %s3509_s27   ;;  %p4376_p10 = scmp.ne.s32.totalorder %s4365_s12, 0 }
 0x712   : > { %p4377_p13 = scmp.ge.s32.totalorder %s3521_s30, 2  ;;  %s2627_s15 = scalar_lea.sflag [#allocation4], %s2626_s21 }
 0x714   : > { %p3152_p3 = pnand %p4377_p13, %p4376_p10 }
 0x716   : > { %3504 = dma.done.wait (!%p3152_p3), %s2627_s15, 128  }
 0x717   : > { %3506 = vsyncadd (!%p3152_p3), %s2627_s15, 4294967168  ;;  %s4378_s30 = sld [smem:[#allocation11_spill]]  ;;  %s4379_s27 = smov %s3513_s28 }
 0x718   : > { %s4380_s28 = smov %s3517_s29  ;;  %s4381_s29 = smov %s3666_s23 }
 0x71d   : > { %p22_p7 = scmp.ge.s32.totalorder %s4378_s30, 4  }
 0x71f   :  { %24 = sbr.rel (!%p22_p7) target bundleno = 6 (0x6), region = 101 }
 0x726   :  { %2632 = vsyncpa [#allocation3], 1 }
 0x727   :  { %2634 = vsyncpa [#allocation3 + $0x1], 1 }
 0x728   :  { %2635 = vsyncpa [#allocation6], 1 }
 0x729   :  { %2636 = vsyncpa [#allocation4], 1 }
 0x72a   :  { %2638 = vsyncpa [#allocation4 + $0x1], 1 }

</bundles_post_ra>
